<compile_context>
chip_gen: v7x
topology: tpu7x:2x2x1
jax: 0.10.0
libtpu: 0.0.40
codegen_flags: <defaults>
</compile_context>

<pallas_src>
import jax
import jax.numpy as jnp
from jax import lax
from jax.experimental import pallas as pl
from jax.experimental.pallas import tpu as pltpu


def bottleneck_kernel(x_ref, w1_ref, b1_ref, w2_ref, b2_ref, w3_ref, b3_ref,
                      out_ref):
    # x_ref:  (1, H, W, Cin)  bf16
    # w1_ref: (Cin, P) bf16     b1_ref: (1, P)    f32
    # w2_ref: (3, 3*P, P) bf16  b2_ref: (1, P)    f32   (axis1 = (kx, cin))
    # w3_ref: (P, Cout) bf16    b3_ref: (1, Cout) f32
    # out_ref:(1, H, W, Cout) bf16
    _, H, W, Cin = x_ref.shape
    P = w1_ref.shape[1]
    Cout = w3_ref.shape[1]

    # ---- conv1 (1x1, BN scale pre-folded) + bias + relu ---------------------
    x2d = x_ref[0].reshape(H * W, Cin)                      # bf16
    h1 = jnp.dot(x2d, w1_ref[...], preferred_element_type=jnp.float32)
    h1 = jnp.maximum(h1 + b1_ref[...], 0.0)                 # (H*W, P) f32

    # ---- conv2 (3x3, stride=1, pad=1) + bias + relu -------------------------
    # Build the kx taps with XLU rolls + edge masks (no padded scratch, no
    # sublane-offset slices), fuse them on the lane axis, then do three
    # K=3P matmuls (one per ky) with leading-dim (cheap) row shifts.
    h1_3d = h1.reshape(H, W, P)
    w_idx = lax.broadcasted_iota(jnp.int32, (H, W, P), 1)
    left = jnp.where(w_idx >= 1,
                     pltpu.roll(h1_3d, shift=1, axis=1), 0.0)       # x[h, w-1]
    right = jnp.where(w_idx < W - 1,
                      pltpu.roll(h1_3d, shift=W - 1, axis=1), 0.0)  # x[h, w+1]
    cat_w = jnp.concatenate([left, h1_3d, right],
                            axis=-1).astype(jnp.bfloat16)           # (H, W, 3P)
    zrow = jnp.zeros((1, W, 3 * P), jnp.bfloat16)
    hpad = jnp.concatenate([zrow, cat_w, zrow], axis=0)             # (H+2, W, 3P)

    acc = jnp.zeros((H * W, P), jnp.float32)
    for ky in range(3):                                             # static unroll
        tap = hpad[ky:ky + H].reshape(H * W, 3 * P)                 # bf16
        acc = acc + jnp.dot(tap, w2_ref[ky],
                            preferred_element_type=jnp.float32)
    h2 = jnp.maximum(acc + b2_ref[...], 0.0).astype(jnp.bfloat16)   # (H*W, P)

    # ---- conv3 (1x1) + bias + residual + relu -------------------------------
    h3 = jnp.dot(h2, w3_ref[...], preferred_element_type=jnp.float32)
    h3 = h3 + b3_ref[...]
    # Residual read at the add site (identity path; downsample=None).
    h3 = h3 + x_ref[0].reshape(H * W, Cin).astype(jnp.float32)
    out_ref[0] = (jnp.maximum(h3, 0.0)
                  .astype(out_ref.dtype)
                  .reshape(H, W, Cout))


def bottleneck_pallas(x, w1, b1, w2k, b2, w3, b3):
    """x: (N, H, W, Cin) bf16 NHWC.  Conv weights are BN-scale-folded bf16:
    w1 (Cin, P), w2k (3, 3*P, P), w3 (P, Cout).  Biases are (1, C) f32.
    Returns (N, H, W, Cout) bfloat16."""
    N, H, W, Cin = x.shape
    Cout = w3.shape[1]
    assert Cout == Cin, "residual add requires inplanes == planes * expansion"

    def full_spec(arr):
        nd = arr.ndim
        return pl.BlockSpec(arr.shape, lambda n, _nd=nd: (0,) * _nd)

    grid_spec = pltpu.PrefetchScalarGridSpec(
        num_scalar_prefetch=0,
        grid=(N,),
        in_specs=[
            pl.BlockSpec((1, H, W, Cin), lambda n: (n, 0, 0, 0)),   # x
            full_spec(w1), full_spec(b1),
            full_spec(w2k), full_spec(b2),
            full_spec(w3), full_spec(b3),
        ],
        out_specs=pl.BlockSpec((1, H, W, Cout), lambda n: (n, 0, 0, 0)),
    )

    return pl.pallas_call(
        bottleneck_kernel,
        out_shape=jax.ShapeDtypeStruct((N, H, W, Cout), jnp.bfloat16),
        grid_spec=grid_spec,
        compiler_params=pltpu.CompilerParams(
            dimension_semantics=("parallel",),
            vmem_limit_bytes=32 * 1024 * 1024),
    )(x, w1, b1, w2k, b2, w3, b3)


# ---------------------- reference (plain JAX, NHWC) -----------------------
def bottleneck_ref(x, w1, b1, w2, b2, w3, b3):
    """f32 reference.  w2 is (9, Cin, Cout) with tap index t = ky*3 + kx."""
    P = w1.shape[1]
    h = jnp.einsum('nhwc,cp->nhwp', x, w1) + b1
    h = jnp.maximum(h, 0.0)
    w2_hwio = w2.reshape(3, 3, P, P)
    h = lax.conv_general_dilated(
        h, w2_hwio, window_strides=(1, 1), padding='SAME',
        dimension_numbers=('NHWC', 'HWIO', 'NHWC')) + b2
    h = jnp.maximum(h, 0.0)
    h = jnp.einsum('nhwp,pq->nhwq', h, w3) + b3
    return jnp.maximum(h + x, 0.0)


def fold_bn(gamma, beta, mean, var, eps=1e-5):
    scale = gamma / jnp.sqrt(var + eps)
    bias = beta - mean * scale
    return scale, bias


if __name__ == "__main__":
    # inplanes = planes * expansion so the identity add is valid
    # (Bottleneck(inplanes=128, planes=32, stride=1, downsample=None)).
    # Cin = Cout = 128 keeps the input DMA and output store lane-dense.
    N, H, W = 2, 16, 16
    planes, expansion = 32, 4
    inplanes = planes * expansion  # 128

    key = jax.random.PRNGKey(0)
    ks = jax.random.split(key, 16)

    # Input (constructed NHWC directly; NCHW->NHWC transpose would be glue).
    x = jax.random.normal(ks[0], (N, H, W, inplanes), jnp.float32)

    # conv weights (PyTorch (Cout, Cin, kH, kW) re-expressed for x @ W)
    w1 = 0.1 * jax.random.normal(ks[1], (inplanes, planes), jnp.float32)
    w2 = 0.1 * jax.random.normal(ks[2], (9, planes, planes), jnp.float32)  # (ky*3+kx, cin, cout)
    w3 = 0.1 * jax.random.normal(ks[3], (planes, inplanes), jnp.float32)

    # BatchNorm params (eval-mode), folded into per-channel scale/bias
    def bn_params(kg, kb, km, kv, c):
        gamma = 1.0 + 0.1 * jax.random.normal(kg, (c,), jnp.float32)
        beta = 0.1 * jax.random.normal(kb, (c,), jnp.float32)
        mean = 0.1 * jax.random.normal(km, (c,), jnp.float32)
        var = jnp.abs(1.0 + 0.1 * jax.random.normal(kv, (c,), jnp.float32))
        return fold_bn(gamma, beta, mean, var)

    s1, b1 = bn_params(ks[4], ks[5], ks[6], ks[7], planes)
    s2, b2 = bn_params(ks[8], ks[9], ks[10], ks[11], planes)
    s3, b3 = bn_params(ks[12], ks[13], ks[14], ks[15], inplanes)

    # Fold BN scales into the conv weights (output-channel axis); keep biases.
    w1f = (w1 * s1[None, :])
    w2f = (w2 * s2[None, None, :])
    w3f = (w3 * s3[None, :])

    # bf16 activations/weights, f32 accumulation & epilogue in the kernel.
    xb = x.astype(jnp.bfloat16)
    w1b = w1f.astype(jnp.bfloat16)
    w2b = w2f.astype(jnp.bfloat16)
    w3b = w3f.astype(jnp.bfloat16)

    # Kernel-side packing of the 3x3 weights: (ky, (kx, cin), cout).
    w2k = w2b.reshape(3, 3, planes, planes).reshape(3, 3 * planes, planes)

    b1k = b1.reshape(1, -1)
    b2k = b2.reshape(1, -1)
    b3k = b3.reshape(1, -1)

    out = bottleneck_pallas(xb, w1b, b1k, w2k, b2k, w3b, b3k)
    out = jax.block_until_ready(out)

    # Reference uses the same bf16-rounded inputs/weights, upcast to f32, so
    # the divergence is in-kernel bf16 rounding of intermediates + the final
    # bf16 store.
    ref = bottleneck_ref(xb.astype(jnp.float32),
                         w1b.astype(jnp.float32), b1,
                         w2b.astype(jnp.float32), b2,
                         w3b.astype(jnp.float32), b3)

    out_f32 = out.astype(jnp.float32)
    assert out.shape == (N, H, W, inplanes)
    assert out.dtype == jnp.bfloat16
    assert jnp.allclose(out_f32, ref, rtol=2e-2, atol=2e-2), \
        f"max abs err {jnp.max(jnp.abs(out_f32 - ref))}"

    print("KERNEL_OK")
</pallas_src>

<mosaic_0001>
module attributes {stable_mosaic.version = 11 : i64} {
  func.func @bottleneck_kernel(%arg0: i32, %arg1: memref<1x16x16x128xbf16, #tpu.memory_space<vmem>>, %arg2: memref<128x32xbf16, #tpu.memory_space<vmem>>, %arg3: memref<1x32xf32, #tpu.memory_space<vmem>>, %arg4: memref<3x96x32xbf16, #tpu.memory_space<vmem>>, %arg5: memref<1x32xf32, #tpu.memory_space<vmem>>, %arg6: memref<32x128xbf16, #tpu.memory_space<vmem>>, %arg7: memref<1x128xf32, #tpu.memory_space<vmem>>, %arg8: memref<1x16x16x128xbf16, #tpu.memory_space<vmem>>) attributes {dimension_semantics = [#tpu.dimension_semantics<parallel>], iteration_bounds = array<i64: 2>, scalar_prefetch = 0 : i64, scratch_operands = 0 : i64, tpu.core_type = #tpu.core_type<tc>, window_params = [{transform_indices = @transform_0, window_bounds = array<i64: 1, 16, 16, 128>}, {pipeline_mode = #tpu.pipeline_mode<synchronous>, transform_indices = @transform_1, window_bounds = array<i64: 128, 32>}, {pipeline_mode = #tpu.pipeline_mode<synchronous>, transform_indices = @transform_2, window_bounds = array<i64: 1, 32>}, {pipeline_mode = #tpu.pipeline_mode<synchronous>, transform_indices = @transform_3, window_bounds = array<i64: 3, 96, 32>}, {pipeline_mode = #tpu.pipeline_mode<synchronous>, transform_indices = @transform_4, window_bounds = array<i64: 1, 32>}, {pipeline_mode = #tpu.pipeline_mode<synchronous>, transform_indices = @transform_5, window_bounds = array<i64: 32, 128>}, {pipeline_mode = #tpu.pipeline_mode<synchronous>, transform_indices = @transform_6, window_bounds = array<i64: 1, 128>}, {transform_indices = @transform_7, window_bounds = array<i64: 1, 16, 16, 128>}]} {
    %c0 = arith.constant 0 : index
    %c0_0 = arith.constant 0 : index
    %c0_1 = arith.constant 0 : index
    %c0_2 = arith.constant 0 : index
    %0 = vector.load %arg1[%c0, %c0_0, %c0_1, %c0_2] : memref<1x16x16x128xbf16, #tpu.memory_space<vmem>>, vector<1x16x16x128xbf16>
    %1 = vector.shape_cast %0 : vector<1x16x16x128xbf16> to vector<16x16x128xbf16>
    %2 = vector.shape_cast %1 : vector<16x16x128xbf16> to vector<256x128xbf16>
    %c0_3 = arith.constant 0 : index
    %c0_4 = arith.constant 0 : index
    %3 = vector.load %arg2[%c0_3, %c0_4] : memref<128x32xbf16, #tpu.memory_space<vmem>>, vector<128x32xbf16>
    %cst = arith.constant dense<0.000000e+00> : vector<256x32xf32>
    %4 = tpu.matmul %2, %3, %cst {dimension_numbers = #tpu.dot_dimension_numbers<[1], [0], [0], [1], [0, 0, 1, 1], [], []>} : vector<256x128xbf16>, vector<128x32xbf16>, vector<256x32xf32> -> vector<256x32xf32>
    %c0_5 = arith.constant 0 : index
    %c0_6 = arith.constant 0 : index
    %5 = vector.load %arg3[%c0_5, %c0_6] : memref<1x32xf32, #tpu.memory_space<vmem>>, vector<1x32xf32>
    %6 = vector.broadcast %5 : vector<1x32xf32> to vector<256x32xf32>
    %7 = arith.addf %4, %6 : vector<256x32xf32>
    %cst_7 = arith.constant 0.000000e+00 : f32
    %8 = vector.broadcast %cst_7 : f32 to vector<256x32xf32>
    %9 = arith.maximumf %7, %8 : vector<256x32xf32>
    %10 = vector.shape_cast %9 : vector<256x32xf32> to vector<16x16x32xf32>
    %11 = tpu.iota {dimensions = array<i32: 1>} : vector<16x16x32xi32>
    %c1_i32 = arith.constant 1 : i32
    %12 = vector.broadcast %c1_i32 : i32 to vector<16x16x32xi32>
    %13 = arith.cmpi sge, %11, %12 : vector<16x16x32xi32>
    %c1_i32_8 = arith.constant 1 : i32
    %14 = tpu.dynamic_rotate %10 by %c1_i32_8 dim 1 : vector<16x16x32xf32>, i32 -> vector<16x16x32xf32>
    %cst_9 = arith.constant 0.000000e+00 : f32
    %15 = vector.broadcast %cst_9 : f32 to vector<16x16x32xf32>
    %16 = arith.select %13, %14, %15 : vector<16x16x32xi1>, vector<16x16x32xf32>
    %c15_i32 = arith.constant 15 : i32
    %17 = vector.broadcast %c15_i32 : i32 to vector<16x16x32xi32>
    %18 = arith.cmpi slt, %11, %17 : vector<16x16x32xi32>
    %c15_i32_10 = arith.constant 15 : i32
    %19 = tpu.dynamic_rotate %10 by %c15_i32_10 dim 1 : vector<16x16x32xf32>, i32 -> vector<16x16x32xf32>
    %cst_11 = arith.constant 0.000000e+00 : f32
    %20 = vector.broadcast %cst_11 : f32 to vector<16x16x32xf32>
    %21 = arith.select %18, %19, %20 : vector<16x16x32xi1>, vector<16x16x32xf32>
    %22 = tpu.concatenate %16, %10, %21 in 2 : vector<16x16x32xf32>, vector<16x16x32xf32>, vector<16x16x32xf32> -> vector<16x16x96xf32>
    %23 = arith.truncf %22 : vector<16x16x96xf32> to vector<16x16x96xbf16>
    %cst_12 = arith.constant 0.000000e+00 : bf16
    %24 = vector.broadcast %cst_12 : bf16 to vector<1x16x96xbf16>
    %25 = tpu.concatenate %24, %23, %24 in 0 : vector<1x16x96xbf16>, vector<16x16x96xbf16>, vector<1x16x96xbf16> -> vector<18x16x96xbf16>
    %cst_13 = arith.constant 0.000000e+00 : f32
    %26 = vector.broadcast %cst_13 : f32 to vector<256x32xf32>
    %27 = vector.extract_strided_slice %25 {offsets = [0, 0, 0], sizes = [16, 16, 96], strides = [1, 1, 1]} : vector<18x16x96xbf16> to vector<16x16x96xbf16>
    %28 = vector.shape_cast %27 : vector<16x16x96xbf16> to vector<256x96xbf16>
    %c0_14 = arith.constant 0 : index
    %c0_15 = arith.constant 0 : index
    %c0_16 = arith.constant 0 : index
    %29 = vector.load %arg4[%c0_14, %c0_15, %c0_16] : memref<3x96x32xbf16, #tpu.memory_space<vmem>>, vector<1x96x32xbf16>
    %30 = vector.shape_cast %29 : vector<1x96x32xbf16> to vector<96x32xbf16>
    %cst_17 = arith.constant dense<0.000000e+00> : vector<256x32xf32>
    %31 = tpu.matmul %28, %30, %cst_17 {dimension_numbers = #tpu.dot_dimension_numbers<[1], [0], [0], [1], [0, 0, 1, 1], [], []>} : vector<256x96xbf16>, vector<96x32xbf16>, vector<256x32xf32> -> vector<256x32xf32>
    %32 = arith.addf %26, %31 : vector<256x32xf32>
    %33 = vector.extract_strided_slice %25 {offsets = [1, 0, 0], sizes = [16, 16, 96], strides = [1, 1, 1]} : vector<18x16x96xbf16> to vector<16x16x96xbf16>
    %34 = vector.shape_cast %33 : vector<16x16x96xbf16> to vector<256x96xbf16>
    %c1 = arith.constant 1 : index
    %c0_18 = arith.constant 0 : index
    %c0_19 = arith.constant 0 : index
    %35 = vector.load %arg4[%c1, %c0_18, %c0_19] : memref<3x96x32xbf16, #tpu.memory_space<vmem>>, vector<1x96x32xbf16>
    %36 = vector.shape_cast %35 : vector<1x96x32xbf16> to vector<96x32xbf16>
    %cst_20 = arith.constant dense<0.000000e+00> : vector<256x32xf32>
    %37 = tpu.matmul %34, %36, %cst_20 {dimension_numbers = #tpu.dot_dimension_numbers<[1], [0], [0], [1], [0, 0, 1, 1], [], []>} : vector<256x96xbf16>, vector<96x32xbf16>, vector<256x32xf32> -> vector<256x32xf32>
    %38 = arith.addf %32, %37 : vector<256x32xf32>
    %39 = vector.extract_strided_slice %25 {offsets = [2, 0, 0], sizes = [16, 16, 96], strides = [1, 1, 1]} : vector<18x16x96xbf16> to vector<16x16x96xbf16>
    %40 = vector.shape_cast %39 : vector<16x16x96xbf16> to vector<256x96xbf16>
    %c2 = arith.constant 2 : index
    %c0_21 = arith.constant 0 : index
    %c0_22 = arith.constant 0 : index
    %41 = vector.load %arg4[%c2, %c0_21, %c0_22] : memref<3x96x32xbf16, #tpu.memory_space<vmem>>, vector<1x96x32xbf16>
    %42 = vector.shape_cast %41 : vector<1x96x32xbf16> to vector<96x32xbf16>
    %cst_23 = arith.constant dense<0.000000e+00> : vector<256x32xf32>
    %43 = tpu.matmul %40, %42, %cst_23 {dimension_numbers = #tpu.dot_dimension_numbers<[1], [0], [0], [1], [0, 0, 1, 1], [], []>} : vector<256x96xbf16>, vector<96x32xbf16>, vector<256x32xf32> -> vector<256x32xf32>
    %44 = arith.addf %38, %43 : vector<256x32xf32>
    %c0_24 = arith.constant 0 : index
    %c0_25 = arith.constant 0 : index
    %45 = vector.load %arg5[%c0_24, %c0_25] : memref<1x32xf32, #tpu.memory_space<vmem>>, vector<1x32xf32>
    %46 = vector.broadcast %45 : vector<1x32xf32> to vector<256x32xf32>
    %47 = arith.addf %44, %46 : vector<256x32xf32>
    %cst_26 = arith.constant 0.000000e+00 : f32
    %48 = vector.broadcast %cst_26 : f32 to vector<256x32xf32>
    %49 = arith.maximumf %47, %48 : vector<256x32xf32>
    %50 = arith.truncf %49 : vector<256x32xf32> to vector<256x32xbf16>
    %c0_27 = arith.constant 0 : index
    %c0_28 = arith.constant 0 : index
    %51 = vector.load %arg6[%c0_27, %c0_28] : memref<32x128xbf16, #tpu.memory_space<vmem>>, vector<32x128xbf16>
    %cst_29 = arith.constant dense<0.000000e+00> : vector<256x128xf32>
    %52 = tpu.matmul %50, %51, %cst_29 {dimension_numbers = #tpu.dot_dimension_numbers<[1], [0], [0], [1], [0, 0, 1, 1], [], []>} : vector<256x32xbf16>, vector<32x128xbf16>, vector<256x128xf32> -> vector<256x128xf32>
    %c0_30 = arith.constant 0 : index
    %c0_31 = arith.constant 0 : index
    %53 = vector.load %arg7[%c0_30, %c0_31] : memref<1x128xf32, #tpu.memory_space<vmem>>, vector<1x128xf32>
    %54 = vector.broadcast %53 : vector<1x128xf32> to vector<256x128xf32>
    %55 = arith.addf %52, %54 : vector<256x128xf32>
    %c0_32 = arith.constant 0 : index
    %c0_33 = arith.constant 0 : index
    %c0_34 = arith.constant 0 : index
    %c0_35 = arith.constant 0 : index
    %56 = vector.load %arg1[%c0_32, %c0_33, %c0_34, %c0_35] : memref<1x16x16x128xbf16, #tpu.memory_space<vmem>>, vector<1x16x16x128xbf16>
    %57 = vector.shape_cast %56 : vector<1x16x16x128xbf16> to vector<16x16x128xbf16>
    %58 = vector.shape_cast %57 : vector<16x16x128xbf16> to vector<256x128xbf16>
    %59 = arith.extf %58 : vector<256x128xbf16> to vector<256x128xf32>
    %60 = arith.addf %55, %59 : vector<256x128xf32>
    %cst_36 = arith.constant 0.000000e+00 : f32
    %61 = vector.broadcast %cst_36 : f32 to vector<256x128xf32>
    %62 = arith.maximumf %60, %61 : vector<256x128xf32>
    %63 = arith.truncf %62 : vector<256x128xf32> to vector<256x128xbf16>
    %64 = vector.shape_cast %63 : vector<256x128xbf16> to vector<16x16x128xbf16>
    %c0_37 = arith.constant 0 : index
    %c0_38 = arith.constant 0 : index
    %c0_39 = arith.constant 0 : index
    %c0_40 = arith.constant 0 : index
    %65 = vector.load %arg8[%c0_37, %c0_38, %c0_39, %c0_40] : memref<1x16x16x128xbf16, #tpu.memory_space<vmem>>, vector<1x16x16x128xbf16>
    %66 = vector.shape_cast %65 : vector<1x16x16x128xbf16> to vector<16x16x128xbf16>
    %67 = vector.shape_cast %64 : vector<16x16x128xbf16> to vector<1x16x16x128xbf16>
    tpu.vector_store %arg8[%c0_37, %c0_38, %c0_39, %c0_40], %67 {strides = array<i32>} : memref<1x16x16x128xbf16, #tpu.memory_space<vmem>>, vector<1x16x16x128xbf16>,
    return
  }
  func.func @transform_0(%arg0: i32) -> (i32, i32, i32, i32) {
    %c0_i32 = arith.constant 0 : i32
    %c0_i32_0 = arith.constant 0 : i32
    %c0_i32_1 = arith.constant 0 : i32
    %c0_i32_2 = arith.constant 0 : i32
    return %arg0, %c0_i32, %c0_i32_0, %c0_i32_1 : i32, i32, i32, i32
  }
  func.func @transform_1(%arg0: i32) -> (i32, i32) {
    %c0_i32 = arith.constant 0 : i32
    %c0_i32_0 = arith.constant 0 : i32
    %c0_i32_1 = arith.constant 0 : i32
    return %c0_i32, %c0_i32_0 : i32, i32
  }
  func.func @transform_2(%arg0: i32) -> (i32, i32) {
    %c0_i32 = arith.constant 0 : i32
    %c0_i32_0 = arith.constant 0 : i32
    %c0_i32_1 = arith.constant 0 : i32
    return %c0_i32, %c0_i32_0 : i32, i32
  }
  func.func @transform_3(%arg0: i32) -> (i32, i32, i32) {
    %c0_i32 = arith.constant 0 : i32
    %c0_i32_0 = arith.constant 0 : i32
    %c0_i32_1 = arith.constant 0 : i32
    %c0_i32_2 = arith.constant 0 : i32
    return %c0_i32, %c0_i32_0, %c0_i32_1 : i32, i32, i32
  }
  func.func @transform_4(%arg0: i32) -> (i32, i32) {
    %c0_i32 = arith.constant 0 : i32
    %c0_i32_0 = arith.constant 0 : i32
    %c0_i32_1 = arith.constant 0 : i32
    return %c0_i32, %c0_i32_0 : i32, i32
  }
  func.func @transform_5(%arg0: i32) -> (i32, i32) {
    %c0_i32 = arith.constant 0 : i32
    %c0_i32_0 = arith.constant 0 : i32
    %c0_i32_1 = arith.constant 0 : i32
    return %c0_i32, %c0_i32_0 : i32, i32
  }
  func.func @transform_6(%arg0: i32) -> (i32, i32) {
    %c0_i32 = arith.constant 0 : i32
    %c0_i32_0 = arith.constant 0 : i32
    %c0_i32_1 = arith.constant 0 : i32
    return %c0_i32, %c0_i32_0 : i32, i32
  }
  func.func @transform_7(%arg0: i32) -> (i32, i32, i32, i32) {
    %c0_i32 = arith.constant 0 : i32
    %c0_i32_0 = arith.constant 0 : i32
    %c0_i32_1 = arith.constant 0 : i32
    %c0_i32_2 = arith.constant 0 : i32
    return %arg0, %c0_i32, %c0_i32_0, %c0_i32_1 : i32, i32, i32, i32
  }
}

</mosaic_0001>

<bundles_post_ra>
// kernel: tpu_custom_call.1
= control target key start
LH: loop header
LB: loop body
LE: loop exit
PB: predicated region body
PF: predicated region fallthrough
CT: control target
= control target key end

     0   :  { %12 = vsyncpa [#allocation3], 0  ;;  %s4708_s0 = inlined_call_operand.vmem [shape: bf16[2,16,16,128], index: 0, kind: input, shape index: {}]   ;;  %s4709_s1 = inlined_call_operand.vmem [shape: bf16[128,32], index: 1, kind: input, shape index: {}]   ;;  %s4710_s2 = inlined_call_operand.vmem [shape: f32[1,32], index: 2, kind: input, shape index: {}]   ;;  %s4711_s3 = inlined_call_operand.vmem [shape: bf16[3,96,32], index: 3, kind: input, shape index: {}]   ;;  %s4712_s4 = inlined_call_operand.vmem [shape: f32[1,32], index: 4, kind: input, shape index: {}]   ;;  %s4713_s5 = inlined_call_operand.vmem [shape: bf16[32,128], index: 5, kind: input, shape index: {}]   ;;  %s4714_s6 = inlined_call_operand.vmem [shape: f32[1,128], index: 6, kind: input, shape index: {}]   ;;  %s4715_s7 = inlined_call_operand.hbm [shape: bf16[2,16,16,128], index: 7, kind: output, shape index: {}]  }
   0x1   :  { %14 = vsyncpa [#allocation3 + $0x1], 0  ;;  %s3667_s24 = smov 0   ;;  %s3669_s25 = smov 0  }
   0x2   :  { %s3671_s26 = smov 0   ;;  %s3673_s27 = smov 0  }
   0x3 LB: > { %s3688_s28 = sadd.s32 4294967295, %s3620_s27   ;;  %s2573_s29 = sadd.s32 4294967294, %s3620_s27   ;;  %s3620_s27 = sphi %s3673_s27, %s4763_s27   ;;  %s3616_s26 = sphi %s3671_s26, %s4762_s26   ;;  %s3612_s25 = sphi %s3669_s25, %s4761_s25   ;;  %s3608_s24 = sphi %s3667_s24, %s4760_s24  }
   0x4   : > { %s3692_s30 = sadd.s32 1, %s3620_s27   ;;  %s179_s8 = sadd.s32 1, %s3616_s26 }
   0x5   : > { %s176_s9 = ssub.s32 %s3620_s27, %s3692_s30  ;;  %p189_p0 = scmp.ne.s32.totalorder %s3616_s26, %s3612_s25 }
   0x6   : > { %p177_p1 = scmp.eq.s32.totalorder %s176_s9, 0  ;;  %p190_p2 = scmp.eq.s32.totalorder %s3688_s28, 1 }
   0x7   : > { %p195_p3 = scmp.ne.s32.totalorder %s3612_s25, %s3608_s24  ;;  %p196_p4 = scmp.eq.s32.totalorder %s2573_s29, 1 }
   0x8   : > { %s3703_s10 = scalar_select %p177_p1, %s3616_s26, %s179_s8  }
   0x9   : > { %p3705_p5 = por %p190_p2, %p189_p0  ;;  %p3709_p6 = por %p196_p4, %p195_p3 }
   0xa   : > { %p2576_p7 = scmp.ge.s32.totalorder %s3620_s27, 1  ;;  %p240_p8 = scmp.lt.s32.totalorder %s3620_s27, 3 }
   0xc   : > { %p241_p9 = pnand %p2576_p7, %p240_p8 }
   0xe   : > { %244 = sbr.rel (%p241_p9) target bundleno = 1049 (0x419), region = 48 }
  0x15   : > { %v3482_v0 = vld [vmem:[%s4709_s1] sm:$0xff]   ;;  %p272_p10 = scmp.lt.s32.totalorder %s3688_s28, 1  ;;  %v3483_v1 = vld [vmem:[%s4709_s1 + $0x8] sm:$0xff]   ;;  %v3484_v2 = vld [vmem:[%s4709_s1 + $0x10] sm:$0xff]   ;;  %v670_v27 = vlaneseq  ;;  %s3622_s21 = smov 32   ;;  %vm1127_vm4 = vcmask 261120  }
  0x16   : > { %2987 = vmatprep.subr.bf16.mxu0 %v3482_v0  ;;  %v3485_v3 = vld [vmem:[%s4709_s1 + $0x18] sm:$0xff]   ;;  %v3486_v5 = vld [vmem:[%s4709_s1 + $0x20] sm:$0xff]   ;;  %v3487_v6 = vld [vmem:[%s4709_s1 + $0x28] sm:$0xff]   ;;  %s3623_s8 = smov 64   ;;  %vm1160_vm5 = vcmask 523264   ;;  %vm1270_vm6 = vcmask 785408  }
  0x17   : > { %s273_s17 = scalar_select %p272_p10, %s3688_s28, 1  ;;  %2988 = vmatpush3.bf16.msra.mxu0 %v3482_v0  ;;  %v3488_v7 = vld [vmem:[%s4709_s1 + $0x30] sm:$0xff]   ;;  %v3489_v8 = vld [vmem:[%s4709_s1 + $0x38] sm:$0xff]   ;;  %v3508_v26 = vld [vmem:[%s4711_s3 + $0x40] sm:$0xff]   ;;  %v3771_v28 = vshrl.u32 %v670_v27, 7 }
  0x18   : > { %2989 = vmatprep.subr.bf16.mxu0 %v3483_v1  ;;  %v3506_v24 = vld [vmem:[%s4711_s3 + $0x30] sm:$0xff]   ;;  %v3507_v25 = vld [vmem:[%s4711_s3 + $0x38] sm:$0xff]   ;;  %v3776_v29 = vld [vmem:[%s4710_s2] ss:$0 sm:$0xff]  ;;  %s269_s18 = sand.u32 1, %s3612_s25   ;;  %s3625_s14 = smov [#allocation2]  }
  0x19   : > { %s2750_s20 = sshll.u32 %s273_s17, 7  ;;  %3203 = vmatprep.subr.bf16.mxu1 %v3506_v24  ;;  %v3780_v33 = vadd.s32 8, %v3771_v28  ;;  %vm707_vm0 = vcmp.lt.s32.totalorder %v3771_v28, 1  ;;  %vm806_vm2 = vcmp.lt.s32.totalorder %v3771_v28, 7  ;;  %vm673_vm3 = vcmp.ge.s32.totalorder %v3771_v28, 1  ;;  %s2577_s19 = sshll.u32 %s269_s18, 7 }
  0x1a   : > { %s3729_s23 = scalar_lea.vmem %s4708_s0, %s2750_s20  ;;  %3209 = vmatpush3.bf16.msra.mxu1 %v3506_v24  ;;  %s4598_s20 = scalar_lea.vmem [#allocation2], %s2577_s19 }
  0x1b   : > { %2990 = vmatpush3.bf16.msra.mxu0 %v3483_v1  ;;  %v278_v4 = vld [vmem:[%s3729_s23] sm:$0xff]   ;;  %v280_v9 = vld [vmem:[%s3729_s23 + $0x8] sm:$0xff]   ;;  %v282_v10 = vld [vmem:[%s3729_s23 + $0x10] sm:$0xff]   ;;  %3204 = vmatprep.subr.bf16.mxu1 %v3507_v25  ;;  %vm773_vm1 = vcmp.lt.s32.totalorder %v3780_v33, 15  ;;  %s3562_s15 = sshll.u32 %s3625_s14, 4  ;;  %s3563_s15 = int_to_ptr.vmem [resolvable:$false] %s3562_s15 }
  0x1c   : > { %2991 = vmatprep.subr.bf16.mxu0 %v3484_v2  ;;  %3003 = vmatprep.mubr.bf16.mxu0 %v278_v4  ;;  %v284_v11 = vld [vmem:[%s3729_s23 + $0x18] sm:$0xff]   ;;  %v286_v12 = vld [vmem:[%s3729_s23 + $0x20] sm:$0xff]   ;;  %v288_v13 = vld [vmem:[%s3729_s23 + $0x28] sm:$0xff]   ;;  %s3564_s16 = scalar_lea.vmem %s3563_s15, 4096 }
  0x1d   : > { %v290_v14 = vld [vmem:[%s3729_s23 + $0x30] sm:$0xff]   ;;  %v292_v15 = vld [vmem:[%s3729_s23 + $0x38] sm:$0xff]   ;;  %v294_v16 = vld [vmem:[%s3729_s23 + $0x40] sm:$0xff]  }
  0x1e   : > { %v296_v17 = vld [vmem:[%s3729_s23 + $0x48] sm:$0xff]   ;;  %v298_v18 = vld [vmem:[%s3729_s23 + $0x50] sm:$0xff]   ;;  %v300_v19 = vld [vmem:[%s3729_s23 + $0x58] sm:$0xff]   ;;  %3210 = vmatpush3.bf16.msra.mxu1 %v3507_v25 }
  0x1f   : > { %2992 = vmatpush3.bf16.msra.mxu0 %v3484_v2  ;;  %v302_v20 = vld [vmem:[%s3729_s23 + $0x60] sm:$0xff]   ;;  %v304_v21 = vld [vmem:[%s3729_s23 + $0x68] sm:$0xff]   ;;  %v306_v22 = vld [vmem:[%s3729_s23 + $0x70] sm:$0xff]   ;;  %3205 = vmatprep.subr.bf16.mxu1 %v3508_v26 }
  0x20   : > { %2993 = vmatprep.subr.bf16.mxu0 %v3485_v3  ;;  %v308_v23 = vld [vmem:[%s3729_s23 + $0x78] sm:$0xff]  }
  0x22   : > { %3211 = vmatpush3.bf16.msra.mxu1 %v3508_v26 }
  0x23   : > { %2994 = vmatpush3.bf16.msra.mxu0 %v3485_v3 }
  0x24   : > { %2995 = vmatprep.subr.bf16.mxu0 %v3486_v5 }
  0x27   : > { %2996 = vmatpush3.bf16.msra.mxu0 %v3486_v5 }
  0x28   : > { %2997 = vmatprep.subr.bf16.mxu0 %v3487_v6 }
  0x2b   : > { %2998 = vmatpush3.bf16.msra.mxu0 %v3487_v6 }
  0x2c   : > { %2999 = vmatprep.subr.bf16.mxu0 %v3488_v7 }
  0x2f   : > { %3000 = vmatpush3.bf16.msra.mxu0 %v3488_v7 }
  0x30   : > { %3001 = vmatprep.subr.bf16.mxu0 %v3489_v8 }
  0x33   : > { %3002 = vmatpush3.bf16.msra.mxu0 %v3489_v8 }
  0x34   : > { %3035 = vmatprep.subr.bf16.mxu0 %v3506_v24 }
  0x36   : > { %3004 = vmatmul.mubr.bf16.vlgmr.msra.gmra.mrb[0].mxu0 %v280_v9 }
  0x37   : > { %3007 = vmatprep.mubr.bf16.mxu0 %v282_v10  ;;  %3036 = vmatpush3.bf16.msra.mxu0 %v3506_v24 }
  0x38   : > { %3037 = vmatprep.subr.bf16.mxu0 %v3507_v25 }
  0x3b   : > { %3038 = vmatpush3.bf16.msra.mxu0 %v3507_v25 }
  0x3c   : > { %3039 = vmatprep.subr.bf16.mxu0 %v3508_v26 }
  0x3e   : > { %3008 = vmatmul.mubr.bf16.gmra.mrb[4].mxu0 %v284_v11 }
  0x3f   : > { %3011 = vmatprep.mubr.bf16.mxu0 %v286_v12  ;;  %3040 = vmatpush3.bf16.msra.mxu0 %v3508_v26 }
  0x46   : > { %3012 = vmatmul.mubr.bf16.gmra.mrb[8].mxu0 %v288_v13 }
  0x47   : > { %3015 = vmatprep.mubr.bf16.mxu0 %v290_v14 }
  0x4e   : > { %3016 = vmatmul.mubr.bf16.gmra.mrb[12].mxu0 %v292_v15 }
  0x4f   : > { %3019 = vmatprep.mubr.bf16.mxu0 %v294_v16 }
  0x56   : > { %3020 = vmatmul.mubr.bf16.gmra.mrb[16].mxu0 %v296_v17 }
  0x57   : > { %3023 = vmatprep.mubr.bf16.mxu0 %v298_v18 }
  0x5e   : > { %3024 = vmatmul.mubr.bf16.gmra.mrb[20].mxu0 %v300_v19 }
  0x5f   : > { %3027 = vmatprep.mubr.bf16.mxu0 %v302_v20 }
  0x66   : > { %3028 = vmatmul.mubr.bf16.gmra.mrb[24].mxu0 %v304_v21 }
  0x67   : > { %3031 = vmatprep.mubr.bf16.mxu0 %v306_v22 }
  0x6e   : > { %3032 = vmatmul.mubr.bf16.gmra.mrb[28].mxu0 %v308_v23 }
 0x109   : > { %v3005_v30 = vpop.f32.mrb[0].mxu0 }
 0x10a   : > { %v520_v31 = vadd.f32 %v3005_v30, %v3776_v29  ;;  %v511_v32 = vpop.f32.mrb[1].mxu0 }
 0x10b   : > { %v512_v34 = vadd.f32 %v3776_v29, %v511_v32  ;;  %v3006_v35 = vpop.f32.mrb[2].mxu0 }
 0x10c   : > { %v3783_v36 = vmax.f32 %v520_v31, 0.0  ;;  %v523_v37 = vadd.f32 %v3006_v35, %v3776_v29  ;;  %v514_v38 = vpop.f32.mrb[3].mxu0 }
 0x10d   : > { %v3786_v39 = vmax.f32 %v512_v34, 0.0  ;;  %v515_v40 = vadd.f32 %v3776_v29, %v514_v38 }
 0x10e   : > { %v3789_v41 = vmax.f32 %v523_v37, 0.0  ;;  %v676_v42 = vrot.slane %v3783_v36, 7  ;;  %v775_v43 = vrot.slane %v3783_v36, 1 }
 0x10f   : > { %v3796_v44 = vmax.f32 %v515_v40, 0.0  ;;  %v675_v45 = vrot.slane %v3786_v39, 7  ;;  %v774_v49 = vrot.slane %v3786_v39, 1 }
 0x110   : > { %v692_v46 = vrot.slane %v3789_v41, 7  ;;  %v791_v47 = vrot.slane %v3789_v41, 1 }
 0x111   : > { %v691_v50 = vrot.slane %v3796_v44, 7  ;;  %v790_v51 = vrot.slane %v3796_v44, 1  ;;  %v3009_v52 = vpop.f32.mrb[4].mxu0 }
 0x112   : > { %v536_v54 = vadd.f32 %v3009_v52, %v3776_v29  ;;  %v527_v55 = vpop.f32.mrb[5].mxu0  ;;  %v3812_v56 = vsel %vm806_vm2, %v775_v43, %v791_v47  ;;  %v824_v57 = vsel %vm806_vm2, %v791_v47, %v775_v43  ;;  %v3818_v58 = vsel %vm707_vm0, %v676_v42, %v692_v46 }
 0x113   : > { %4718 = vst [vmem:[#allocation5_spill] sm:$0xff] %v3818_v58  ;;  %v528_v59 = vadd.f32 %v3776_v29, %v527_v55  ;;  %v3010_v60 = vpop.f32.mrb[6].mxu0  ;;  %v3823_v61 = vsel %vm806_vm2, %v774_v49, %v790_v51  ;;  %v823_v62 = vsel %vm806_vm2, %v790_v51, %v774_v49  ;;  %v3829_v63 = vsel %vm773_vm1, %v824_v57, 0.0 }
 0x114   : > { %v3831_v0 = vmax.f32 %v536_v54, 0.0  ;;  %v539_v1 = vadd.f32 %v3010_v60, %v3776_v29  ;;  %v530_v2 = vpop.f32.mrb[7].mxu0  ;;  %v3836_v3 = vsel %vm773_vm1, %v823_v62, 0.0  ;;  %v3847_v8 = vsel %vm707_vm0, %v675_v45, %v691_v50 }
 0x115   : > { %v3840_v5 = vmax.f32 %v528_v59, 0.0  ;;  %v531_v6 = vadd.f32 %v3776_v29, %v530_v2  ;;  %4719 = vst [vmem:[#allocation6_spill] sm:$0xff] %v3847_v8  ;;  %v724_v12 = vsel %vm707_vm0, %v691_v50, %v675_v45  ;;  %v725_v20 = vsel %vm707_vm0, %v692_v46, %v676_v42 }
 0x116   : > { %v678_v9 = vrot.slane %v3831_v0, 7  ;;  %v777_v10 = vrot.slane %v3831_v0, 1  ;;  %v3851_v11 = vmax.f32 %v539_v1, 0.0  ;;  %v3861_v16 = vsel %vm673_vm3, %v724_v12, 0.0 }
 0x117   : > { %v677_v13 = vrot.slane %v3840_v5, 7  ;;  %v776_v14 = vrot.slane %v3840_v5, 1  ;;  %v3857_v15 = vmax.f32 %v531_v6, 0.0  ;;  %4720 = vst [vmem:[#allocation7_spill] sm:$0xff] %v3861_v16  ;;  %v3875_v25 = vsel %vm673_vm3, %v725_v20, 0.0  ;;  %v3509_v6 = vld [vmem:[%s4711_s3 + $0x48] sm:$0xff]  }
 0x118   : > { %v694_v17 = vrot.slane %v3851_v11, 7  ;;  %v793_v18 = vrot.slane %v3851_v11, 1  ;;  %4721 = vst [vmem:[#allocation8_spill] sm:$0xff] %v3875_v25  ;;  %3206 = vmatprep.subr.bf16.mxu1 %v3509_v6  ;;  %3041 = vmatprep.subr.bf16.mxu0 %v3509_v6  ;;  %v4737_v28 = vpack.i.bf16 %v3836_v3, %v3823_v61 }
 0x119   : > { %v693_v21 = vrot.slane %v3857_v15, 7  ;;  %v792_v22 = vrot.slane %v3857_v15, 1  ;;  %v3013_v23 = vpop.f32.mrb[8].mxu0  ;;  %3212 = vmatpush3.bf16.msra.mxu1 %v3509_v6  ;;  %3042 = vmatpush3.bf16.msra.mxu0 %v3509_v6 }
 0x11a   : > { %v552_v26 = vadd.f32 %v3013_v23, %v3776_v29  ;;  %v543_v27 = vpop.f32.mrb[9].mxu0  ;;  %v3880_v30 = vsel %vm806_vm2, %v777_v10, %v793_v18  ;;  %v826_v31 = vsel %vm806_vm2, %v793_v18, %v777_v10  ;;  %v3886_v32 = vsel %vm707_vm0, %v678_v9, %v694_v17 }
 0x11b   : > { %4722 = vst [vmem:[#allocation9_spill] sm:$0xff] %v3886_v32  ;;  %v544_v34 = vadd.f32 %v3776_v29, %v543_v27  ;;  %v3014_v35 = vpop.f32.mrb[10].mxu0  ;;  %v3891_v37 = vsel %vm806_vm2, %v776_v14, %v792_v22  ;;  %v825_v38 = vsel %vm806_vm2, %v792_v22, %v776_v14  ;;  %v3897_v40 = vsel %vm773_vm1, %v826_v31, 0.0 }
 0x11c   : > { %v3899_v42 = vmax.f32 %v552_v26, 0.0  ;;  %v555_v43 = vadd.f32 %v3014_v35, %v3776_v29  ;;  %v546_v45 = vpop.f32.mrb[11].mxu0  ;;  %v3904_v46 = vsel %vm773_vm1, %v825_v38, 0.0  ;;  %v3915_v52 = vsel %vm707_vm0, %v677_v13, %v693_v21 }
 0x11d   : > { %v3908_v49 = vmax.f32 %v544_v34, 0.0  ;;  %v547_v50 = vadd.f32 %v3776_v29, %v546_v45  ;;  %4723 = vst [vmem:[#allocation10_spill] sm:$0xff] %v3915_v52  ;;  %v726_v55 = vsel %vm707_vm0, %v693_v21, %v677_v13  ;;  %v727_v10 = vsel %vm707_vm0, %v694_v17, %v678_v9 }
 0x11e   : > { %v3917_v54 = vmax.f32 %v555_v43, 0.0  ;;  %v779_v57 = vrot.slane %v3899_v42, 1  ;;  %v3926_v60 = vsel %vm673_vm3, %v726_v55, 0.0  ;;  %v3943_v20 = vsel %vm673_vm3, %v727_v10, 0.0 }
 0x11f   : > { %v3922_v59 = vmax.f32 %v547_v50, 0.0  ;;  %4724 = vst [vmem:[#allocation11_spill] sm:$0xff] %v3926_v60  ;;  %v778_v62 = vrot.slane %v3908_v49, 1  ;;  %4725 = vst [vmem:[#allocation12_spill] sm:$0xff] %v3943_v20  ;;  %v679_v21 = vrot.slane %v3908_v49, 7 }
 0x120   : > { %v795_v1 = vrot.slane %v3917_v54, 1  ;;  %v4744_v61 = vpack.i.bf16 %v3917_v54, %v3899_v42 }
 0x121   : > { %v695_v12 = vrot.slane %v3922_v59, 7  ;;  %v794_v13 = vrot.slane %v3922_v59, 1  ;;  %v3017_v14 = vpop.f32.mrb[12].mxu0 }
 0x122   : > { %v568_v22 = vadd.f32 %v3017_v14, %v3776_v29  ;;  %v559_v23 = vpop.f32.mrb[13].mxu0  ;;  %v3949_v9 = vsel %vm806_vm2, %v779_v57, %v795_v1  ;;  %v828_v17 = vsel %vm806_vm2, %v795_v1, %v779_v57  ;;  %v3510_v57 = vld [vmem:[%s4711_s3 + $0x50] sm:$0xff]  }
 0x123   : > { %v560_v26 = vadd.f32 %v3776_v29, %v559_v23  ;;  %v3018_v27 = vpop.f32.mrb[14].mxu0  ;;  %v3956_v31 = vsel %vm806_vm2, %v778_v62, %v794_v13  ;;  %v827_v34 = vsel %vm806_vm2, %v794_v13, %v778_v62  ;;  %v3962_v35 = vsel %vm773_vm1, %v828_v17, 0.0  ;;  %3207 = vmatprep.subr.bf16.mxu1 %v3510_v57  ;;  %3043 = vmatprep.subr.bf16.mxu0 %v3510_v57 }
 0x124   : > { %v3964_v38 = vmax.f32 %v568_v22, 0.0  ;;  %v571_v43 = vadd.f32 %v3018_v27, %v3776_v29  ;;  %v562_v45 = vpop.f32.mrb[15].mxu0  ;;  %v3969_v50 = vsel %vm773_vm1, %v827_v34, 0.0  ;;  %v3981_v10 = vsel %vm707_vm0, %v679_v21, %v695_v12  ;;  %3213 = vmatpush3.bf16.msra.mxu1 %v3510_v57  ;;  %3044 = vmatpush3.bf16.msra.mxu0 %v3510_v57 }
 0x125   : > { %v650_v62 = vmax.f32 %v560_v26, 0.0  ;;  %v563_v1 = vadd.f32 %v3776_v29, %v562_v45  ;;  %4726 = vst [vmem:[#allocation13_spill] sm:$0xff] %v3981_v10  ;;  %v728_v23 = vsel %vm707_vm0, %v695_v12, %v679_v21 }
 0x126   : > { %v653_v22 = vmax.f32 %v571_v43, 0.0  ;;  %v682_v17 = vrot.slane %v3964_v38, 7  ;;  %v781_v26 = vrot.slane %v3964_v38, 1  ;;  %v3991_v34 = vsel %vm673_vm3, %v728_v23, 0.0 }
 0x127   : > { %v651_v27 = vmax.f32 %v563_v1, 0.0  ;;  %4727 = vst [vmem:[#allocation14_spill] sm:$0xff] %v3991_v34  ;;  %v681_v45 = vrot.slane %v650_v62, 7  ;;  %v780_v2 = vrot.slane %v650_v62, 1  ;;  %v3511_v1 = vld [vmem:[%s4711_s3 + $0x58] sm:$0xff]  }
 0x128   : > { %v698_v55 = vrot.slane %v653_v22, 7  ;;  %v797_v6 = vrot.slane %v653_v22, 1  ;;  %v3327_v43 = vpack.i.bf16 %v653_v22, %v3964_v38  ;;  %3208 = vmatprep.subr.bf16.mxu1 %v3511_v1  ;;  %3045 = vmatprep.subr.bf16.mxu0 %v3511_v1 }
 0x129   : > { %v697_v18 = vrot.slane %v651_v27, 7  ;;  %v796_v47 = vrot.slane %v651_v27, 1  ;;  %v3021_v12 = vpop.f32.mrb[16].mxu0  ;;  %v3322_v21 = vpack.i.bf16 %v651_v27, %v650_v62  ;;  %3214 = vmatpush3.bf16.msra.mxu1 %v3511_v1  ;;  %3046 = vmatpush3.bf16.msra.mxu0 %v3511_v1 }
 0x12a   : > { %v584_v57 = vadd.f32 %v3021_v12, %v3776_v29  ;;  %v575_v51 = vpop.f32.mrb[17].mxu0  ;;  %v814_v23 = vsel %vm806_vm2, %v781_v26, %v797_v6  ;;  %v830_v19 = vsel %vm806_vm2, %v797_v6, %v781_v26  ;;  %v4004_v38 = vsel %vm707_vm0, %v682_v17, %v698_v55 }
 0x12b   : > { %v576_v22 = vadd.f32 %v3776_v29, %v575_v51  ;;  %v3022_v62 = vpop.f32.mrb[18].mxu0  ;;  %3323 = vrot.lane.b32.xlu0 %v3322_v21, %s3622_s21  ;;  %v813_v27 = vsel %vm806_vm2, %v780_v2, %v796_v47  ;;  %v829_v12 = vsel %vm806_vm2, %v796_v47, %v780_v2  ;;  %v854_v24 = vsel %vm773_vm1, %v830_v19, 0.0  ;;  %v4027_v19 = vld [vmem:[%s4711_s3] sm:$0xff]  }
 0x12c   : > { %v4014_v6 = vmax.f32 %v584_v57, 0.0  ;;  %v587_v26 = vadd.f32 %v3022_v62, %v3776_v29  ;;  %v578_v4 = vpop.f32.mrb[19].mxu0  ;;  %v852_v51 = vsel %vm773_vm1, %v829_v12, 0.0  ;;  %v3337_v7 = vpack.i.bf16 %v854_v24, %v814_v23  ;;  %3079 = vmatprep.subr.bf16.mxu1 %v4027_v19 }
 0x12d   : > { %v654_v21 = vmax.f32 %v576_v22, 0.0  ;;  %v579_v48 = vadd.f32 %v3776_v29, %v578_v4  ;;  %v3332_v53 = vpack.i.bf16 %v852_v51, %v813_v27  ;;  %v4022_v47 = vsel %vm707_vm0, %v681_v45, %v697_v18 }
 0x12e   : > { %v684_v2 = vrot.slane %v4014_v6, 7  ;;  %v783_v24 = vrot.slane %v4014_v6, 1  ;;  %v657_v57 = vmax.f32 %v587_v26, 0.0  ;;  %v730_v23 = vsel %vm707_vm0, %v697_v18, %v681_v45 }
 0x12f   : > { %v683_v4 = vrot.slane %v654_v21, 7  ;;  %v782_v22 = vrot.slane %v654_v21, 1  ;;  %v655_v62 = vmax.f32 %v579_v48, 0.0  ;;  %3328 = vrot.lane.b32.xlu0 %v3327_v43, %s3622_s21  ;;  %3333 = vrot.lane.b32.xlu1 %v3332_v53, %s3623_s8  ;;  %v4037_v27 = vsel %vm673_vm3, %v730_v23, 0.0 }
 0x130   : > { %v700_v1 = vrot.slane %v657_v57, 7  ;;  %v799_v12 = vrot.slane %v657_v57, 1  ;;  %v3342_v51 = vpack.i.bf16 %v657_v57, %v4014_v6  ;;  %v731_v26 = vsel %vm707_vm0, %v698_v55, %v682_v17 }
 0x131   : > { %v699_v18 = vrot.slane %v655_v62, 7  ;;  %v798_v48 = vrot.slane %v655_v62, 1  ;;  %v3025_v45 = vpop.f32.mrb[20].mxu0  ;;  %v3347_v43 = vpack.i.bf16 %v655_v62, %v654_v21  ;;  %v4045_v53 = vsel %vm673_vm3, %v731_v26, 0.0 }
 0x132   : > { %v600_v23 = vadd.f32 %v3025_v45, %v3776_v29  ;;  %v591_v13 = vpop.f32.mrb[21].mxu0  ;;  %v816_v14 = vsel %vm806_vm2, %v783_v24, %v799_v12  ;;  %v832_v6 = vsel %vm806_vm2, %v799_v12, %v783_v24  ;;  %v4054_v55 = vsel %vm707_vm0, %v684_v2, %v700_v1 }
 0x133   : > { %v592_v17 = vadd.f32 %v3776_v29, %v591_v13  ;;  %v3026_v21 = vpop.f32.mrb[22].mxu0  ;;  %3348 = vrot.lane.b32.xlu0 %v3347_v43, %s3622_s21  ;;  %3338 = vrot.lane.b32.xlu1 %v3337_v7, %s3623_s8  ;;  %v815_v57 = vsel %vm806_vm2, %v782_v22, %v798_v48  ;;  %v831_v62 = vsel %vm806_vm2, %v798_v48, %v782_v22  ;;  %v858_v24 = vsel %vm773_vm1, %v832_v6, 0.0 }
 0x134   : > { %v4065_v12 = vmax.f32 %v600_v23, 0.0  ;;  %v603_v26 = vadd.f32 %v3026_v21, %v3776_v29  ;;  %v594_v45 = vpop.f32.mrb[23].mxu0  ;;  %v856_v13 = vsel %vm773_vm1, %v831_v62, 0.0  ;;  %v3352_v43 = vpack.i.bf16 %v858_v24, %v816_v14 }
 0x135   : > { %v658_v34 = vmax.f32 %v592_v17, 0.0  ;;  %v595_v7 = vadd.f32 %v3776_v29, %v594_v45  ;;  %v3357_v10 = vpack.i.bf16 %v856_v13, %v815_v57  ;;  %v4073_v20 = vsel %vm707_vm0, %v683_v4, %v699_v18 }
 0x136   : > { %v686_v22 = vrot.slane %v4065_v12, 7  ;;  %v785_v48 = vrot.slane %v4065_v12, 1  ;;  %v661_v23 = vmax.f32 %v603_v26, 0.0  ;;  %v732_v6 = vsel %vm707_vm0, %v699_v18, %v683_v4 }
 0x137   : > { %v685_v21 = vrot.slane %v658_v34, 7  ;;  %v784_v32 = vrot.slane %v658_v34, 1  ;;  %v659_v62 = vmax.f32 %v595_v7, 0.0  ;;  %3358 = vrot.lane.b32.xlu0 %v3357_v10, %s3623_s8  ;;  %3343 = vrot.lane.b32.xlu1 %v3342_v51, %s3622_s21  ;;  %v4083_v14 = vsel %vm673_vm3, %v732_v6, 0.0 }
 0x138   : > { %v702_v17 = vrot.slane %v661_v23, 7  ;;  %v801_v57 = vrot.slane %v661_v23, 1  ;;  %v3362_v24 = vpack.i.bf16 %v661_v23, %v4065_v12  ;;  %v733_v26 = vsel %vm707_vm0, %v700_v1, %v684_v2 }
 0x139   : > { %v701_v45 = vrot.slane %v659_v62, 7  ;;  %v800_v4 = vrot.slane %v659_v62, 1  ;;  %v3029_v18 = vpop.f32.mrb[24].mxu0  ;;  %v3367_v13 = vpack.i.bf16 %v659_v62, %v658_v34  ;;  %v4090_v10 = vsel %vm673_vm3, %v733_v26, 0.0 }
 0x13a   : > { %v616_v51 = vadd.f32 %v3029_v18, %v3776_v29  ;;  %v607_v7 = vpop.f32.mrb[25].mxu0  ;;  %v818_v6 = vsel %vm806_vm2, %v785_v48, %v801_v57  ;;  %v834_v12 = vsel %vm806_vm2, %v801_v57, %v785_v48  ;;  %v4099_v2 = vsel %vm707_vm0, %v686_v22, %v702_v17 }
 0x13b   : > { %4728 = vst [vmem:[#allocation15_spill] sm:$0xff] %v4099_v2  ;;  %v608_v1 = vadd.f32 %v3776_v29, %v607_v7  ;;  %v3030_v34 = vpop.f32.mrb[26].mxu0  ;;  %3368 = vrot.lane.b32.xlu0 %v3367_v13, %s3622_s21  ;;  %3353 = vrot.lane.b32.xlu1 %v3352_v43, %s3623_s8  ;;  %v817_v23 = vsel %vm806_vm2, %v784_v32, %v800_v4  ;;  %v862_v48 = vsel %vm773_vm1, %v834_v12, 0.0 }
 0x13c   : > { %v833_v62 = vsel %vm806_vm2, %v800_v4, %v784_v32  ;;  %v4110_v57 = vmax.f32 %v616_v51, 0.0  ;;  %v619_v26 = vadd.f32 %v3030_v34, %v3776_v29  ;;  %v610_v18 = vpop.f32.mrb[27].mxu0  ;;  %v3372_v13 = vpack.i.bf16 %v862_v48, %v818_v6 }
 0x13d   : > { %v860_v7 = vsel %vm773_vm1, %v833_v62, 0.0  ;;  %v662_v60 = vmax.f32 %v608_v1, 0.0  ;;  %v611_v43 = vadd.f32 %v3776_v29, %v610_v18  ;;  %v4118_v25 = vsel %vm707_vm0, %v685_v21, %v701_v45 }
 0x13e   : > { %v3377_v52 = vpack.i.bf16 %v860_v7, %v817_v23  ;;  %v688_v32 = vrot.slane %v4110_v57, 7  ;;  %v787_v4 = vrot.slane %v4110_v57, 1  ;;  %v665_v51 = vmax.f32 %v619_v26, 0.0 }
 0x13f   : > { %v734_v12 = vsel %vm707_vm0, %v701_v45, %v685_v21  ;;  %v687_v34 = vrot.slane %v662_v60, 7  ;;  %v786_v58 = vrot.slane %v662_v60, 1  ;;  %v663_v62 = vmax.f32 %v611_v43, 0.0  ;;  %3363 = vrot.lane.b32.xlu1 %v3362_v24, %s3622_s21 }
 0x140   : > { %3378 = vrot.lane.b32.xlu0 %v3377_v52, %s3623_s8  ;;  %v4128_v6 = vsel %vm673_vm3, %v734_v12, 0.0  ;;  %v704_v1 = vrot.slane %v665_v51, 7  ;;  %v803_v23 = vrot.slane %v665_v51, 1  ;;  %v3382_v48 = vpack.i.bf16 %v665_v51, %v4110_v57 }
 0x141   : > { %v735_v26 = vsel %vm707_vm0, %v702_v17, %v686_v22  ;;  %v703_v18 = vrot.slane %v663_v62, 7  ;;  %v802_v21 = vrot.slane %v663_v62, 1  ;;  %v3033_v45 = vpop.f32.mrb[28].mxu0  ;;  %v3387_v7 = vpack.i.bf16 %v663_v62, %v662_v60 }
 0x142   : > { %v4135_v52 = vsel %vm673_vm3, %v735_v26, 0.0  ;;  %v632_v24 = vadd.f32 %v3033_v45, %v3776_v29  ;;  %v623_v43 = vpop.f32.mrb[29].mxu0  ;;  %v820_v12 = vsel %vm806_vm2, %v787_v4, %v803_v23  ;;  %v836_v57 = vsel %vm806_vm2, %v803_v23, %v787_v4 }
 0x143   : > { %4729 = vst [vmem:[#allocation16_spill] sm:$0xff] %v4135_v52  ;;  %v4144_v22 = vsel %vm707_vm0, %v688_v32, %v704_v1  ;;  %v624_v17 = vadd.f32 %v3776_v29, %v623_v43  ;;  %v3034_v60 = vpop.f32.mrb[30].mxu0  ;;  %3373 = vrot.lane.b32.xlu1 %v3372_v13, %s3623_s8  ;;  %v819_v51 = vsel %vm806_vm2, %v786_v58, %v802_v21  ;;  %v866_v4 = vsel %vm773_vm1, %v836_v57, 0.0 }
 0x144   : > { %4730 = vst [vmem:[#allocation17_spill] sm:$0xff] %v4144_v22  ;;  %3388 = vrot.lane.b32.xlu0 %v3387_v7, %s3622_s21  ;;  %v835_v62 = vsel %vm806_vm2, %v802_v21, %v786_v58  ;;  %v668_v23 = vmax.f32 %v632_v24, 0.0  ;;  %v635_v26 = vadd.f32 %v3034_v60, %v3776_v29  ;;  %v626_v45 = vpop.f32.mrb[31].mxu0  ;;  %v3392_v8 = vpack.i.bf16 %v866_v4, %v820_v12 }
 0x145   : > { %v864_v43 = vsel %vm773_vm1, %v835_v62, 0.0  ;;  %v666_v7 = vmax.f32 %v624_v17, 0.0  ;;  %v627_v13 = vadd.f32 %v3776_v29, %v626_v45  ;;  %v4161_v22 = vsel %vm707_vm0, %v687_v34, %v703_v18 }
 0x146   : > { %v3397_v16 = vpack.i.bf16 %v864_v43, %v819_v51  ;;  %v690_v58 = vrot.slane %v668_v23, 7  ;;  %v789_v21 = vrot.slane %v668_v23, 1  ;;  %v669_v52 = vmax.f32 %v635_v26, 0.0 }
 0x147   : > { %v736_v24 = vsel %vm707_vm0, %v703_v18, %v687_v34  ;;  %v689_v57 = vrot.slane %v666_v7, 7  ;;  %v788_v60 = vrot.slane %v666_v7, 1  ;;  %v667_v2 = vmax.f32 %v627_v13, 0.0  ;;  %3383 = vrot.lane.b32.xlu1 %v3382_v48, %s3622_s21 }
 0x148   : > { %3398 = vrot.lane.b32.xlu0 %v3397_v16, %s3623_s8  ;;  %v4169_v29 = vsel %vm673_vm3, %v736_v24, 0.0  ;;  %v706_v12 = vrot.slane %v669_v52, 7  ;;  %v805_v17 = vrot.slane %v669_v52, 1  ;;  %v3402_v51 = vpack.i.bf16 %v669_v52, %v668_v23 }
 0x149   : > { %v737_v62 = vsel %vm707_vm0, %v704_v1, %v688_v32  ;;  %v705_v4 = vrot.slane %v667_v2, 7  ;;  %v804_v26 = vrot.slane %v667_v2, 1  ;;  %v3407_v34 = vpack.i.bf16 %v667_v2, %v666_v7 }
 0x14a   : > { %v4175_v18 = vsel %vm673_vm3, %v737_v62, 0.0  ;;  %v822_v16 = vsel %vm806_vm2, %v789_v21, %v805_v17  ;;  %v838_v48 = vsel %vm806_vm2, %v805_v17, %v789_v21  ;;  %v4183_v45 = vsel %vm707_vm0, %v690_v58, %v706_v12 }
 0x14b   : > { %v739_v32 = vsel %vm707_vm0, %v706_v12, %v690_v58  ;;  %3393 = vrot.lane.b32.xlu1 %v3392_v8, %s3623_s8  ;;  %v821_v2 = vsel %vm806_vm2, %v788_v60, %v804_v26  ;;  %v837_v1 = vsel %vm806_vm2, %v804_v26, %v788_v60  ;;  %v870_v52 = vsel %vm773_vm1, %v838_v48, 0.0 }
 0x14c   : > { %3408 = vrot.lane.b32.xlu0 %v3407_v34, %s3622_s21  ;;  %v4197_v23 = vsel %vm707_vm0, %v689_v57, %v705_v4  ;;  %v868_v43 = vsel %vm773_vm1, %v837_v1, 0.0  ;;  %v3417_v7 = vpack.i.bf16 %v870_v52, %v822_v16  ;;  %v738_v8 = vsel %vm707_vm0, %v705_v4, %v689_v57 }
 0x14d   : > { %v4205_v13 = vsel %vm673_vm3, %v739_v32, 0.0  ;;  %v3412_v58 = vpack.i.bf16 %v868_v43, %v821_v2  ;;  %v4209_v21 = vsel %vm673_vm3, %v738_v8, 0.0  ;;  %v4731_v24 = vrot.slane %v3917_v54, 7 }
 0x14e   : > { %v4732_v60 = vrot.slane %v3899_v42, 7  ;;  %v4735_v4 = vpack.i.bf16 %v3796_v44, %v3786_v39  ;;  %v4736_v26 = vpack.i.bf16 %v3789_v41, %v3783_v36  ;;  %v4739_v39 = vpack.i.bf16 %v3857_v15, %v3840_v5 }
 0x14f   : > { %v4734_v57 = vmov %v4731_v24  ;;  %3403 = vrot.lane.b32.xlu1 %v3402_v51, %s3622_s21  ;;  %v4738_v51 = vpack.i.bf16 %v3829_v63, %v3812_v56  ;;  %v4740_v36 = vpack.i.bf16 %v3851_v11, %v3831_v0  ;;  %v4741_v41 = vpack.i.bf16 %v3904_v46, %v3891_v37 }
 0x150   : > { %v4217_v33 = vsel %vm707_vm0, %v4732_v60, %v4731_v24  ;;  %v4733_v12 = vmov %v4732_v60  ;;  %3413 = vrot.lane.b32.xlu0 %v3412_v58, %s3623_s8  ;;  %v4742_v44 = vpack.i.bf16 %v3897_v40, %v3880_v30  ;;  %v4743_v56 = vpack.i.bf16 %v3922_v59, %v3908_v49 }
 0x151   : > { %v729_v17 = vsel %vm707_vm0, %v4734_v57, %v4733_v12  ;;  %v4745_v63 = vpack.i.bf16 %v3969_v50, %v3956_v31  ;;  %v4746_v0 = vpack.i.bf16 %v3962_v35, %v3949_v9 }
 0x152   : > { %v4227_v62 = vsel %vm673_vm3, %v729_v17, 0.0 }
 0x153   : > { %3418 = vrot.lane.b32.xlu1 %v3417_v7, %s3623_s8 }
 0x154   : > { %3423 = vrot.lane.b32.xlu0 %v4735_v4, %s3622_s21 }
 0x157   : > { %3428 = vrot.lane.b32.xlu1 %v4737_v28, %s3623_s8 }
 0x158   : > { %3433 = vrot.lane.b32.xlu0 %v4736_v26, %s3622_s21 }
 0x15b   : > { %3438 = vrot.lane.b32.xlu1 %v4739_v39, %s3622_s21 }
 0x15c   : > { %3443 = vrot.lane.b32.xlu0 %v4738_v51, %s3623_s8 }
 0x15f   : > { %3448 = vrot.lane.b32.xlu1 %v4741_v41, %s3623_s8 }
 0x160   : > { %3453 = vrot.lane.b32.xlu0 %v4740_v36, %s3622_s21 }
 0x163   : > { %3458 = vrot.lane.b32.xlu1 %v4743_v56, %s3622_s21 }
 0x164   : > { %3463 = vrot.lane.b32.xlu0 %v4742_v44, %s3623_s8 }
 0x167   : > { %3468 = vrot.lane.b32.xlu1 %v4745_v63, %s3623_s8 }
 0x168   : > { %3473 = vrot.lane.b32.xlu0 %v4744_v61, %s3622_s21  ;;  %s2511_s21 = sshll.u32 %s4598_s20, 4  ;;  %s4659_s21 = int_to_ptr.vmem [resolvable:$true] %s2511_s21 }
 0x169   : > { %s3558_s13 = scalar_lea.vmem %s4659_s21, 2048  ;;  %p3565_p0 = scmp.lt.s32.totalorder %s4659_s21, %s3563_s15 }
 0x16a   : > { %p3559_p11 = scmp.ne.s32.totalorder %s4659_s21, %s3558_s13  ;;  %p3566_p1 = scmp.lt.s32.totalorder %s3564_s16, %s3558_s13 }
 0x16b   : > { %3478 = vrot.lane.b32.xlu1 %v4746_v0, %s3623_s8 }
 0x16c   : > { %p3560_p12 = pnand %p3559_p11, %p3705_p5  ;;  %p3567_p2 = por %p3566_p1, %p3565_p0 }
 0x16e   : > { %p3561_p13 = pneg %p3560_p12 }
 0x170   : > { %p3568_p3 = pnand %p3567_p2, %p3561_p13 }
 0x19d   : > { %v3324_v3 = vpop.permute.xlu0 %3323 }
 0x19e   : > { %v3326_v5 = vunpack.i.h.bf16 %v3324_v3  ;;  %v3325_v11 = vunpack.i.l.bf16 %v3324_v3 }
 0x1a0   : > { %v1140_v42 = vsel %vm1127_vm4, %v4037_v27, %v3325_v11  ;;  %v1141_v46 = vsel %vm1127_vm4, %v4022_v47, %v3326_v5 }
 0x1a1   : > { %v3329_v15 = vpop.permute.xlu0 %3328  ;;  %v3334_v30 = vpop.permute.xlu1 %3333 }
 0x1a2   : > { %v3336_v37 = vunpack.i.h.bf16 %v3334_v30  ;;  %v3335_v40 = vunpack.i.l.bf16 %v3334_v30  ;;  %v3331_v49 = vunpack.i.h.bf16 %v3329_v15  ;;  %v3330_v54 = vunpack.i.l.bf16 %v3329_v15 }
 0x1a4   : > { %v1173_v59 = vsel %vm1160_vm5, %v1140_v42, %v3335_v40  ;;  %v1174_v9 = vsel %vm1160_vm5, %v1141_v46, %v3336_v37  ;;  %v1143_v48 = vsel %vm1127_vm4, %v4004_v38, %v3331_v49  ;;  %v1142_v27 = vsel %vm1127_vm4, %v4045_v53, %v3330_v54  ;;  %v3513_v38 = vld [vmem:[%s4711_s3 + $0x8] sm:$0xff]  }
 0x1a5   : > { %v3349_v31 = vpop.permute.xlu0 %3348  ;;  %v3339_v35 = vpop.permute.xlu1 %3338  ;;  %v4286_v50 = vpack.c.bf16 %v1174_v9, %v1173_v59  ;;  %v4747_v59 = vld [vmem:[#allocation15_spill] sm:$0xff] }
 0x1a6   : > { %v3341_v34 = vunpack.i.h.bf16 %v3339_v35  ;;  %v3340_v16 = vunpack.i.l.bf16 %v3339_v35  ;;  %v3351_v47 = vunpack.i.h.bf16 %v3349_v31  ;;  %v3350_v32 = vunpack.i.l.bf16 %v3349_v31  ;;  %v4748_v31 = vld [vmem:[#allocation16_spill] sm:$0xff] }
 0x1a7   : > { %3059 = vmatprep.mubr.msk.bf16.mxu1 %vm1270_vm6, %v4286_v50 }
 0x1a8   : > { %v1176_v2 = vsel %vm1160_vm5, %v1143_v48, %v3341_v34  ;;  %v1175_v1 = vsel %vm1160_vm5, %v1142_v27, %v3340_v16  ;;  %v1145_v53 = vsel %vm1127_vm4, %v4073_v20, %v3351_v47  ;;  %v1144_v24 = vsel %vm1127_vm4, %v4083_v14, %v3350_v32  ;;  %v3514_v20 = vld [vmem:[%s4711_s3 + $0x10] sm:$0xff]  }
 0x1a9   : > { %v4296_v52 = vpack.c.bf16 %v1176_v2, %v1175_v1  ;;  %v3359_v43 = vpop.permute.xlu0 %3358  ;;  %v3344_v7 = vpop.permute.xlu1 %3343  ;;  %v3517_v1 = vld [vmem:[%s4711_s3 + $0x28] sm:$0xff]  }
 0x1aa   : > { %v3361_v8 = vunpack.i.h.bf16 %v3359_v43  ;;  %v3360_v58 = vunpack.i.l.bf16 %v3359_v43  ;;  %v3346_v60 = vunpack.i.h.bf16 %v3344_v7  ;;  %v3345_v12 = vunpack.i.l.bf16 %v3344_v7 }
 0x1ab   : > { %3060 = vmatmul.mubr.msk.bf16.vlgmr.msra.gmra.mrb[0].mxu1 %vm1270_vm6, %v4296_v52 }
 0x1ac   : > { %v1177_v57 = vsel %vm1160_vm5, %v1144_v24, %v3360_v58  ;;  %v1178_v17 = vsel %vm1160_vm5, %v1145_v53, %v3361_v8  ;;  %3080 = vmatpush3.bf16.msra.mxu1 %v4027_v19  ;;  %v1147_v39 = vsel %vm1127_vm4, %v4054_v55, %v3346_v60  ;;  %v1146_v36 = vsel %vm1127_vm4, %v4090_v10, %v3345_v12  ;;  %v3515_v55 = vld [vmem:[%s4711_s3 + $0x18] sm:$0xff]  }
 0x1ad   : > { %v4310_v4 = vpack.c.bf16 %v1178_v17, %v1177_v57  ;;  %v3369_v26 = vpop.permute.xlu0 %3368  ;;  %v3354_v28 = vpop.permute.xlu1 %3353  ;;  %3081 = vmatprep.subr.bf16.mxu1 %v3513_v38 }
 0x1ae   : > { %v3356_v14 = vunpack.i.h.bf16 %v3354_v28  ;;  %v3355_v51 = vunpack.i.l.bf16 %v3354_v28  ;;  %v3371_v41 = vunpack.i.h.bf16 %v3369_v26  ;;  %v3370_v44 = vunpack.i.l.bf16 %v3369_v26  ;;  %v4749_v28 = vld [vmem:[#allocation17_spill] sm:$0xff] }
 0x1af   : > { %3063 = vmatprep.mubr.msk.bf16.mxu1 %vm1270_vm6, %v4310_v4 }
 0x1b0   : > { %v1179_v19 = vsel %vm1160_vm5, %v1146_v36, %v3355_v51  ;;  %v1180_v56 = vsel %vm1160_vm5, %v1147_v39, %v3356_v14  ;;  %3082 = vmatpush3.bf16.msra.mxu1 %v3513_v38  ;;  %v1149_v5 = vsel %vm1127_vm4, %v4118_v25, %v3371_v41  ;;  %v1148_v11 = vsel %vm1127_vm4, %v4128_v6, %v3370_v44  ;;  %v3516_v25 = vld [vmem:[%s4711_s3 + $0x20] sm:$0xff]  }
 0x1b1   : > { %v4323_v61 = vpack.c.bf16 %v1180_v56, %v1179_v19  ;;  %v3364_v0 = vpop.permute.xlu1 %3363  ;;  %3083 = vmatprep.subr.bf16.mxu1 %v3514_v20 }
 0x1b2   : > { %v3379_v63 = vpop.permute.xlu0 %3378  ;;  %v3366_v15 = vunpack.i.h.bf16 %v3364_v0  ;;  %v3365_v30 = vunpack.i.l.bf16 %v3364_v0 }
 0x1b3   : > { %v3381_v10 = vunpack.i.h.bf16 %v3379_v63  ;;  %v3380_v3 = vunpack.i.l.bf16 %v3379_v63  ;;  %3064 = vmatmul.mubr.msk.bf16.gmra.mrb[4].mxu1 %vm1270_vm6, %v4323_v61 }
 0x1b4   : > { %3084 = vmatpush3.bf16.msra.mxu1 %v3514_v20  ;;  %v1151_v9 = vsel %vm1127_vm4, %v4747_v59, %v3366_v15  ;;  %v1150_v35 = vsel %vm1127_vm4, %v4748_v31, %v3365_v30 }
 0x1b5   : > { %v1181_v37 = vsel %vm1160_vm5, %v1148_v11, %v3380_v3  ;;  %v1182_v40 = vsel %vm1160_vm5, %v1149_v5, %v3381_v10  ;;  %v3374_v49 = vpop.permute.xlu1 %3373  ;;  %3085 = vmatprep.subr.bf16.mxu1 %v3515_v55 }
 0x1b6   : > { %v4336_v42 = vpack.c.bf16 %v1182_v40, %v1181_v37  ;;  %v3389_v46 = vpop.permute.xlu0 %3388  ;;  %v3376_v6 = vunpack.i.h.bf16 %v3374_v49  ;;  %v3375_v54 = vunpack.i.l.bf16 %v3374_v49 }
 0x1b7   : > { %v3391_v34 = vunpack.i.h.bf16 %v3389_v46  ;;  %v3390_v16 = vunpack.i.l.bf16 %v3389_v46 }
 0x1b8   : > { %3067 = vmatprep.mubr.msk.bf16.mxu1 %vm1270_vm6, %v4336_v42  ;;  %v1183_v48 = vsel %vm1160_vm5, %v1150_v35, %v3375_v54  ;;  %v1184_v27 = vsel %vm1160_vm5, %v1151_v9, %v3376_v6  ;;  %3086 = vmatpush3.bf16.msra.mxu1 %v3515_v55 }
 0x1b9   : > { %v4349_v47 = vpack.c.bf16 %v1184_v27, %v1183_v48  ;;  %v3384_v2 = vpop.permute.xlu1 %3383  ;;  %3087 = vmatprep.subr.bf16.mxu1 %v3516_v25  ;;  %v1153_v38 = vsel %vm1127_vm4, %v4161_v22, %v3391_v34  ;;  %v1152_v8 = vsel %vm1127_vm4, %v4169_v29, %v3390_v16  ;;  %v4367_v22 = vld [vmem:[%s4711_s3 + $0x60] sm:$0xff]   ;;  %v4750_v16 = vld [vmem:[#allocation7_spill] sm:$0xff]  ;;  %v4751_v48 = vld [vmem:[#allocation6_spill] sm:$0xff] }
 0x1ba   : > { %v3399_v32 = vpop.permute.xlu0 %3398  ;;  %v3386_v58 = vunpack.i.h.bf16 %v3384_v2  ;;  %v3385_v53 = vunpack.i.l.bf16 %v3384_v2 }
 0x1bb   : > { %v3401_v43 = vunpack.i.h.bf16 %v3399_v32  ;;  %v3400_v7 = vunpack.i.l.bf16 %v3399_v32  ;;  %3068 = vmatmul.mubr.msk.bf16.gmra.mrb[8].mxu1 %vm1270_vm6, %v4349_v47 }
 0x1bc   : > { %3088 = vmatpush3.bf16.msra.mxu1 %v3516_v25  ;;  %v1155_v20 = vsel %vm1127_vm4, %v4749_v28, %v3386_v58  ;;  %v1154_v14 = vsel %vm1127_vm4, %v4175_v18, %v3385_v53 }
 0x1bd   : > { %v1185_v24 = vsel %vm1160_vm5, %v1152_v8, %v3400_v7  ;;  %v1186_v60 = vsel %vm1160_vm5, %v1153_v38, %v3401_v43  ;;  %v3394_v17 = vpop.permute.xlu1 %3393  ;;  %3089 = vmatprep.subr.bf16.mxu1 %v3517_v1  ;;  %v3624_v43 = vmov 0  }
 0x1be   : > { %v4362_v12 = vpack.c.bf16 %v1186_v60, %v1185_v24  ;;  %v3409_v57 = vpop.permute.xlu0 %3408  ;;  %v3396_v29 = vunpack.i.h.bf16 %v3394_v17  ;;  %v3395_v26 = vunpack.i.l.bf16 %v3394_v17  ;;  %v4752_v24 = vld [vmem:[#allocation5_spill] sm:$0xff] }
 0x1bf   : > { %v3411_v51 = vunpack.i.h.bf16 %v3409_v57  ;;  %v3410_v39 = vunpack.i.l.bf16 %v3409_v57  ;;  %v4753_v57 = vld [vmem:[#allocation8_spill] sm:$0xff] }
 0x1c0   : > { %3071 = vmatprep.mubr.msk.bf16.mxu1 %vm1270_vm6, %v4362_v12  ;;  %v1187_v36 = vsel %vm1160_vm5, %v1154_v14, %v3395_v26  ;;  %v1188_v41 = vsel %vm1160_vm5, %v1155_v20, %v3396_v29  ;;  %3090 = vmatpush3.bf16.msra.mxu1 %v3517_v1 }
 0x1c1   : > { %v4377_v44 = vpack.c.bf16 %v1188_v41, %v1187_v36  ;;  %v3404_v56 = vpop.permute.xlu1 %3403  ;;  %3123 = vmatprep.subr.bf16.mxu1 %v4367_v22  ;;  %v1157_v18 = vsel %vm1127_vm4, %v4197_v23, %v3411_v51  ;;  %v1156_v55 = vsel %vm1127_vm4, %v4209_v21, %v3410_v39  ;;  %v3519_v36 = vld [vmem:[%s4711_s3 + $0x68] sm:$0xff]  }
 0x1c2   : > { %v3414_v19 = vpop.permute.xlu0 %3413  ;;  %v3406_v10 = vunpack.i.h.bf16 %v3404_v56  ;;  %v3405_v3 = vunpack.i.l.bf16 %v3404_v56  ;;  %v4754_v56 = vld [vmem:[#allocation10_spill] sm:$0xff] }
 0x1c3   : > { %v3416_v63 = vunpack.i.h.bf16 %v3414_v19  ;;  %v3415_v0 = vunpack.i.l.bf16 %v3414_v19  ;;  %3072 = vmatmul.mubr.msk.bf16.gmra.mrb[12].mxu1 %vm1270_vm6, %v4377_v44 }
 0x1c4   : > { %v1159_v23 = vsel %vm1127_vm4, %v4183_v45, %v3406_v10  ;;  %v1158_v21 = vsel %vm1127_vm4, %v4205_v13, %v3405_v3 }
 0x1c5   : > { %v1189_v5 = vsel %vm1160_vm5, %v1156_v55, %v3415_v0  ;;  %v1190_v11 = vsel %vm1160_vm5, %v1157_v18, %v3416_v63  ;;  %v3419_v30 = vpop.permute.xlu1 %3418  ;;  %v4755_v0 = vld [vmem:[#allocation11_spill] sm:$0xff] }
 0x1c6   : > { %v4388_v15 = vpack.c.bf16 %v1190_v11, %v1189_v5  ;;  %v3424_v37 = vpop.permute.xlu0 %3423  ;;  %v3421_v40 = vunpack.i.h.bf16 %v3419_v30  ;;  %v3420_v46 = vunpack.i.l.bf16 %v3419_v30 }
 0x1c7   : > { %v3426_v49 = vunpack.i.h.bf16 %v3424_v37  ;;  %v3425_v25 = vunpack.i.l.bf16 %v3424_v37 }
 0x1c8   : > { %3075 = vmatprep.mubr.msk.bf16.mxu1 %vm1270_vm6, %v4388_v15  ;;  %v1191_v6 = vsel %vm1160_vm5, %v1158_v21, %v3420_v46  ;;  %v1192_v54 = vsel %vm1160_vm5, %v1159_v23, %v3421_v40  ;;  %v3520_v40 = vld [vmem:[%s4711_s3 + $0x70] sm:$0xff]   ;;  %v4756_v21 = vld [vmem:[#allocation9_spill] sm:$0xff] }
 0x1c9   : > { %v4398_v59 = vpack.c.bf16 %v1192_v54, %v1191_v6  ;;  %v3429_v31 = vpop.permute.xlu1 %3428  ;;  %v1128_v45 = vsel %vm1127_vm4, %v4750_v16, %v3425_v25  ;;  %v1129_v13 = vsel %vm1127_vm4, %v4751_v48, %v3426_v49  ;;  %v4757_v25 = vld [vmem:[#allocation12_spill] sm:$0xff] }
 0x1ca   : > { %v3434_v9 = vpop.permute.xlu0 %3433  ;;  %v3431_v35 = vunpack.i.h.bf16 %v3429_v31  ;;  %v3430_v34 = vunpack.i.l.bf16 %v3429_v31 }
 0x1cb   : > { %v3436_v27 = vunpack.i.h.bf16 %v3434_v9  ;;  %v3435_v32 = vunpack.i.l.bf16 %v3434_v9  ;;  %3076 = vmatmul.mubr.msk.bf16.gmra.mrb[16].mxu1 %vm1270_vm6, %v4398_v59 }
 0x1cc   : > { %v1161_v2 = vsel %vm1160_vm5, %v1128_v45, %v3430_v34  ;;  %v1162_v1 = vsel %vm1160_vm5, %v1129_v13, %v3431_v35  ;;  %3091 = vmatprep.mubr.bf16.mxu1 %v3624_v43  ;;  %v3521_v13 = vld [vmem:[%s4711_s3 + $0x78] sm:$0xff]  }
 0x1cd   : > { %v1193_v7 = vpack.c.bf16 %v1162_v1, %v1161_v2  ;;  %v3439_v8 = vpop.permute.xlu1 %3438  ;;  %v1131_v60 = vsel %vm1127_vm4, %v4752_v24, %v3436_v27  ;;  %v1130_v17 = vsel %vm1127_vm4, %v4753_v57, %v3435_v32  ;;  %v4758_v27 = vld [vmem:[#allocation13_spill] sm:$0xff]  ;;  %v4759_v2 = vld [vmem:[#allocation14_spill] sm:$0xff] }
 0x1ce   : > { %v3444_v38 = vpop.permute.xlu0 %3443  ;;  %v3441_v29 = vunpack.i.h.bf16 %v3439_v8  ;;  %v3440_v26 = vunpack.i.l.bf16 %v3439_v8 }
 0x1cf   : > { %v3446_v58 = vunpack.i.h.bf16 %v3444_v38  ;;  %v3445_v53 = vunpack.i.l.bf16 %v3444_v38  ;;  %3047 = vmatprep.mubr.msk.bf16.mxu0 %vm1270_vm6, %v1193_v7 }
 0x1d0   : > { %v1133_v63 = vsel %vm1127_vm4, %v4754_v56, %v3441_v29  ;;  %v1132_v18 = vsel %vm1127_vm4, %v4755_v0, %v3440_v26 }
 0x1d1   : > { %v1163_v28 = vsel %vm1160_vm5, %v1130_v17, %v3445_v53  ;;  %v1164_v20 = vsel %vm1160_vm5, %v1131_v60, %v3446_v58  ;;  %v3449_v39 = vpop.permute.xlu1 %3448  ;;  %v3522_v17 = vld [vmem:[%s4711_s3 + $0x80] sm:$0xff]  }
 0x1d2   : > { %v4416_v14 = vpack.c.bf16 %v1164_v20, %v1163_v28  ;;  %v3454_v51 = vpop.permute.xlu0 %3453  ;;  %v3451_v41 = vunpack.i.h.bf16 %v3449_v39  ;;  %v3450_v19 = vunpack.i.l.bf16 %v3449_v39  ;;  %v3523_v39 = vld [vmem:[%s4711_s3 + $0x88] sm:$0xff]  }
 0x1d3   : > { %v3456_v55 = vunpack.i.h.bf16 %v3454_v51  ;;  %v3455_v10 = vunpack.i.l.bf16 %v3454_v51  ;;  %3092 = vmatmul.mubr.msk.bf16.vlgmr.msra.gmra.mrb[20].mxu1 %vm1270_vm6, %v1193_v7 }
 0x1d4   : > { %3048 = vmatmul.mubr.msk.bf16.vlgmr.msra.gmra.mrb[32].mxu0 %vm1270_vm6, %v4416_v14  ;;  %v1165_v3 = vsel %vm1160_vm5, %v1132_v18, %v3450_v19  ;;  %v1166_v5 = vsel %vm1160_vm5, %v1133_v63, %v3451_v41  ;;  %3124 = vmatpush3.bf16.msra.mxu1 %v4367_v22 }
 0x1d5   : > { %v4431_v11 = vpack.c.bf16 %v1166_v5, %v1165_v3  ;;  %3095 = vmatprep.mubr.msk.bf16.mxu1 %vm1270_vm6, %v4416_v14  ;;  %v3459_v37 = vpop.permute.xlu1 %3458  ;;  %3125 = vmatprep.subr.bf16.mxu1 %v3519_v36  ;;  %v1135_v49 = vsel %vm1127_vm4, %v4756_v21, %v3456_v55  ;;  %v1134_v22 = vsel %vm1127_vm4, %v4757_v25, %v3455_v10 }
 0x1d6   : > { %v3464_v30 = vpop.permute.xlu0 %3463  ;;  %v3461_v6 = vunpack.i.h.bf16 %v3459_v37  ;;  %v3460_v54 = vunpack.i.l.bf16 %v3459_v37 }
 0x1d7   : > { %v3466_v46 = vunpack.i.h.bf16 %v3464_v30  ;;  %v3465_v23 = vunpack.i.l.bf16 %v3464_v30  ;;  %3051 = vmatprep.mubr.msk.bf16.mxu0 %vm1270_vm6, %v4431_v11 }
 0x1d8   : > { %3126 = vmatpush3.bf16.msra.mxu1 %v3519_v36  ;;  %v1137_v32 = vsel %vm1127_vm4, %v4758_v27, %v3461_v6  ;;  %v1136_v1 = vsel %vm1127_vm4, %v4759_v2, %v3460_v54 }
 0x1d9   : > { %v1167_v9 = vsel %vm1160_vm5, %v1134_v22, %v3465_v23  ;;  %v1168_v31 = vsel %vm1160_vm5, %v1135_v49, %v3466_v46  ;;  %v3469_v16 = vpop.permute.xlu1 %3468  ;;  %3127 = vmatprep.subr.bf16.mxu1 %v3520_v40 }
 0x1da   : > { %v1196_v35 = vpack.c.bf16 %v1168_v31, %v1167_v9  ;;  %v3474_v34 = vpop.permute.xlu0 %3473  ;;  %v3471_v45 = vunpack.i.h.bf16 %v3469_v16  ;;  %v3470_v48 = vunpack.i.l.bf16 %v3469_v16 }
 0x1db   : > { %v3476_v7 = vunpack.i.h.bf16 %v3474_v34  ;;  %v3475_v38 = vunpack.i.l.bf16 %v3474_v34  ;;  %3096 = vmatmul.mubr.msk.bf16.gmra.mrb[24].mxu1 %vm1270_vm6, %v4431_v11 }
 0x1dc   : > { %3052 = vmatmul.mubr.msk.bf16.gmra.mrb[36].mxu0 %vm1270_vm6, %v1196_v35  ;;  %v1169_v8 = vsel %vm1160_vm5, %v1136_v1, %v3470_v48  ;;  %v1170_v58 = vsel %vm1160_vm5, %v1137_v32, %v3471_v45  ;;  %3099 = vmatprep.mubr.msk.bf16.mxu1 %vm1270_vm6, %v1196_v35 }
 0x1dd   : > { %v1197_v53 = vpack.c.bf16 %v1170_v58, %v1169_v8  ;;  %v3479_v24 = vpop.permute.xlu1 %3478  ;;  %3128 = vmatpush3.bf16.msra.mxu1 %v3520_v40  ;;  %v1139_v29 = vsel %vm1127_vm4, %v4217_v33, %v3476_v7  ;;  %v1138_v26 = vsel %vm1127_vm4, %v4227_v62, %v3475_v38  ;;  %v3524_v33 = vld [vmem:[%s4713_s5] sm:$0xff]   ;;  %v3525_v62 = vld [vmem:[%s4713_s5 + $0x8] sm:$0xff]  }
 0x1de   : > { %v3481_v60 = vunpack.i.h.bf16 %v3479_v24  ;;  %v3480_v57 = vunpack.i.l.bf16 %v3479_v24  ;;  %3129 = vmatprep.subr.bf16.mxu1 %v3521_v13  ;;  %3167 = vmatprep.subr.bf16.mxu0 %v3524_v33 }
 0x1df   : > { %3055 = vmatprep.mubr.msk.bf16.mxu0 %vm1270_vm6, %v1197_v53  ;;  %3168 = vmatpush3.bf16.msra.mxu0 %v3524_v33 }
 0x1e0   : > { %v1172_v28 = vsel %vm1160_vm5, %v1139_v29, %v3481_v60  ;;  %v1171_v20 = vsel %vm1160_vm5, %v1138_v26, %v3480_v57  ;;  %3169 = vmatprep.subr.bf16.mxu0 %v3525_v62 }
 0x1e1   : > { %v1198_v51 = vpack.c.bf16 %v1172_v28, %v1171_v20  ;;  %3130 = vmatpush3.bf16.msra.mxu1 %v3521_v13 }
 0x1e2   : > { %3131 = vmatprep.subr.bf16.mxu1 %v3522_v17 }
 0x1e3   : > { %3100 = vmatmul.mubr.msk.bf16.gmra.mrb[28].mxu1 %vm1270_vm6, %v1197_v53  ;;  %3170 = vmatpush3.bf16.msra.mxu0 %v3525_v62 }
 0x1e4   : > { %3056 = vmatmul.mubr.msk.bf16.gmra.mrb[40].mxu0 %vm1270_vm6, %v1198_v51  ;;  %3103 = vmatprep.mubr.msk.bf16.mxu1 %vm1270_vm6, %v1198_v51 }
 0x1e5   : > { %3132 = vmatpush3.bf16.msra.mxu1 %v3522_v17 }
 0x1e6   : > { %3133 = vmatprep.subr.bf16.mxu1 %v3523_v39 }
 0x1e9   : > { %3134 = vmatpush3.bf16.msra.mxu1 %v3523_v39 }
 0x1eb   : > { %3104 = vmatmul.mubr.msk.bf16.gmra.mrb[0].mxu1 %vm1270_vm6, %v4286_v50 }
 0x1ec   : > { %3107 = vmatprep.mubr.msk.bf16.mxu1 %vm1270_vm6, %v4296_v52 }
 0x1f3   : > { %3108 = vmatmul.mubr.msk.bf16.gmra.mrb[4].mxu1 %vm1270_vm6, %v4310_v4 }
 0x1f4   : > { %3111 = vmatprep.mubr.msk.bf16.mxu1 %vm1270_vm6, %v4323_v61 }
 0x1fb   : > { %3112 = vmatmul.mubr.msk.bf16.gmra.mrb[8].mxu1 %vm1270_vm6, %v4336_v42 }
 0x1fc   : > { %3115 = vmatprep.mubr.msk.bf16.mxu1 %vm1270_vm6, %v4349_v47 }
 0x203   : > { %3116 = vmatmul.mubr.msk.bf16.gmra.mrb[12].mxu1 %vm1270_vm6, %v4362_v12 }
 0x204   : > { %3119 = vmatprep.mubr.msk.bf16.mxu1 %vm1270_vm6, %v4377_v44 }
 0x20b   : > { %3120 = vmatmul.mubr.msk.bf16.gmra.mrb[16].mxu1 %vm1270_vm6, %v4388_v15 }
 0x20c   : > { %3135 = vmatprep.mubr.msk.bf16.mxu1 %vm1270_vm6, %v4416_v14 }
 0x213   : > { %3136 = vmatmul.mubr.msk.bf16.vlgmr.msra.gmra.mrb[20].mxu1 %vm1270_vm6, %v4431_v11 }
 0x214   : > { %3139 = vmatprep.mubr.msk.bf16.mxu1 %vm1270_vm6, %v1196_v35 }
 0x21b   : > { %3140 = vmatmul.mubr.msk.bf16.gmra.mrb[24].mxu1 %vm1270_vm6, %v1197_v53 }
 0x21c   : > { %3143 = vmatprep.mubr.msk.bf16.mxu1 %vm1270_vm6, %v1198_v51 }
 0x223   : > { %3144 = vmatmul.mubr.msk.bf16.gmra.mrb[28].mxu1 %vm1270_vm6, %v4286_v50 }
 0x224   : > { %3147 = vmatprep.mubr.msk.bf16.mxu1 %vm1270_vm6, %v4296_v52 }
 0x22b   : > { %3148 = vmatmul.mubr.msk.bf16.gmra.mrb[0].mxu1 %vm1270_vm6, %v4310_v4 }
 0x22c   : > { %3151 = vmatprep.mubr.msk.bf16.mxu1 %vm1270_vm6, %v4323_v61 }
 0x233   : > { %3152 = vmatmul.mubr.msk.bf16.gmra.mrb[4].mxu1 %vm1270_vm6, %v4336_v42 }
 0x234   : > { %3155 = vmatprep.mubr.msk.bf16.mxu1 %vm1270_vm6, %v4349_v47 }
 0x23b   : > { %3156 = vmatmul.mubr.msk.bf16.gmra.mrb[8].mxu1 %vm1270_vm6, %v4362_v12 }
 0x23c   : > { %3159 = vmatprep.mubr.msk.bf16.mxu1 %vm1270_vm6, %v4377_v44 }
 0x243   : > { %3160 = vmatmul.mubr.msk.bf16.gmra.mrb[12].mxu1 %vm1270_vm6, %v4388_v15 }
 0x244   : > { %3163 = vmatprep.mubr.msk.bf16.mxu1 %vm1270_vm6, %v4398_v59 }
 0x24b   : > { %3164 = vmatmul.mubr.bf16.gmra.mrb[16].mxu1 %v3624_v43  ;;  %v4530_v43 = vld [vmem:[%s4712_s4] ss:$0 sm:$0xff] }
 0x2a7   : > { %v3049_v50 = vpop.f32.mrb[32].mxu0 }
 0x2a8   : > { %v1353_v52 = vpop.f32.mrb[33].mxu0 }
 0x2a9   : > { %v3050_v4 = vpop.f32.mrb[34].mxu0 }
 0x2aa   : > { %v1356_v61 = vpop.f32.mrb[35].mxu0 }
 0x2af   : > { %v3053_v42 = vpop.f32.mrb[36].mxu0 }
 0x2b0   : > { %v1369_v47 = vpop.f32.mrb[37].mxu0 }
 0x2b1   : > { %v3054_v12 = vpop.f32.mrb[38].mxu0 }
 0x2b2   : > { %v1372_v44 = vpop.f32.mrb[39].mxu0 }
 0x2b7   : > { %v3057_v15 = vpop.f32.mrb[40].mxu0 }
 0x2b8   : > { %v1385_v14 = vpop.f32.mrb[41].mxu0 }
 0x2b9   : > { %v3058_v36 = vpop.f32.mrb[42].mxu0 }
 0x2ba   : > { %v1388_v59 = vpop.f32.mrb[43].mxu0 }
 0x2e6   : > { %v3137_v41 = vpop.f32.mrb[20].mxu1 }
 0x2e7   : > { %v3215_v19 = vadd.f32 %v3137_v41, %v3049_v50  ;;  %v1763_v56 = vpop.f32.mrb[21].mxu1 }
 0x2e8   : > { %v3216_v63 = vadd.f32 %v1763_v56, %v1353_v52  ;;  %v3138_v0 = vpop.f32.mrb[22].mxu1 }
 0x2e9   : > { %v1931_v18 = vadd.f32 %v3215_v19, %v4530_v43  ;;  %v3217_v55 = vadd.f32 %v3138_v0, %v3050_v4  ;;  %v1766_v10 = vpop.f32.mrb[23].mxu1 }
 0x2ea   : > { %v1929_v3 = vadd.f32 %v3216_v63, %v4530_v43  ;;  %v3218_v5 = vadd.f32 %v1766_v10, %v1356_v61 }
 0x2eb   : > { %v1932_v11 = vadd.f32 %v3217_v55, %v4530_v43  ;;  %v1963_v37 = vmax.f32 %v1931_v18, 0.0 }
 0x2ec   : > { %v1930_v30 = vadd.f32 %v3218_v5, %v4530_v43  ;;  %v1961_v46 = vmax.f32 %v1929_v3, 0.0 }
 0x2ed   : > { %v1964_v40 = vmax.f32 %v1932_v11, 0.0 }
 0x2ee   : > { %v1962_v23 = vmax.f32 %v1930_v30, 0.0  ;;  %v3141_v21 = vpop.f32.mrb[24].mxu1 }
 0x2ef   : > { %v1994_v49 = vpack.c.bf16 %v1964_v40, %v1963_v37  ;;  %v3219_v25 = vadd.f32 %v3141_v21, %v3053_v42  ;;  %v1779_v22 = vpop.f32.mrb[25].mxu1 }
 0x2f0   : > { %v1993_v6 = vpack.c.bf16 %v1962_v23, %v1961_v46  ;;  %v3220_v54 = vadd.f32 %v1779_v22, %v1369_v47  ;;  %v3142_v9 = vpop.f32.mrb[26].mxu1 }
 0x2f1   : > { %v1935_v31 = vadd.f32 %v3219_v25, %v4530_v43  ;;  %v3221_v35 = vadd.f32 %v3142_v9, %v3054_v12  ;;  %v1782_v34 = vpop.f32.mrb[27].mxu1 }
 0x2f2   : > { %v1933_v16 = vadd.f32 %v3220_v54, %v4530_v43  ;;  %v3222_v45 = vadd.f32 %v1782_v34, %v1372_v44  ;;  %3171 = vmatprep.mubr.msk.bf16.mxu0 %vm1127_vm4, %v1993_v6 }
 0x2f3   : > { %v1936_v48 = vadd.f32 %v3221_v35, %v4530_v43  ;;  %3172 = vmatmul.mubr.msk.bf16.vlgmr.msra.gmra.mrb[44].mxu0 %vm1127_vm4, %v1994_v49  ;;  %v1967_v27 = vmax.f32 %v1935_v31, 0.0 }
 0x2f4   : > { %v1934_v13 = vadd.f32 %v3222_v45, %v4530_v43  ;;  %v1965_v2 = vmax.f32 %v1933_v16, 0.0 }
 0x2f5   : > { %v1968_v32 = vmax.f32 %v1936_v48, 0.0 }
 0x2f6   : > { %v1966_v1 = vmax.f32 %v1934_v13, 0.0  ;;  %v3145_v7 = vpop.f32.mrb[28].mxu1 }
 0x2f7   : > { %v1996_v38 = vpack.c.bf16 %v1968_v32, %v1967_v27  ;;  %v3223_v8 = vadd.f32 %v3145_v7, %v3057_v15  ;;  %v1795_v58 = vpop.f32.mrb[29].mxu1 }
 0x2f8   : > { %v1995_v53 = vpack.c.bf16 %v1966_v1, %v1965_v2  ;;  %v3224_v24 = vadd.f32 %v1795_v58, %v1385_v14  ;;  %v3146_v60 = vpop.f32.mrb[30].mxu1 }
 0x2f9   : > { %v1939_v57 = vadd.f32 %v3223_v8, %v4530_v43  ;;  %v3225_v17 = vadd.f32 %v3146_v60, %v3058_v36  ;;  %v1798_v29 = vpop.f32.mrb[31].mxu1 }
 0x2fa   : > { %v1937_v26 = vadd.f32 %v3224_v24, %v4530_v43  ;;  %v3226_v28 = vadd.f32 %v1798_v29, %v1388_v59  ;;  %3175 = vmatprep.mubr.msk.bf16.mxu0 %vm1127_vm4, %v1995_v53 }
 0x2fb   : > { %v1940_v20 = vadd.f32 %v3225_v17, %v4530_v43  ;;  %3176 = vmatmul.mubr.msk.bf16.gmra.mrb[48].mxu0 %vm1127_vm4, %v1996_v38  ;;  %v1971_v39 = vmax.f32 %v1939_v57, 0.0 }
 0x2fc   : > { %v1938_v51 = vadd.f32 %v3226_v28, %v4530_v43  ;;  %v1969_v62 = vmax.f32 %v1937_v26, 0.0 }
 0x2fd   : > { %v1972_v33 = vmax.f32 %v1940_v20, 0.0 }
 0x2fe   : > { %v1970_v50 = vmax.f32 %v1938_v51, 0.0  ;;  %v3149_v52 = vpop.f32.mrb[0].mxu1 }
 0x2ff   : > { %v1998_v4 = vpack.c.bf16 %v1972_v33, %v1971_v39  ;;  %v1943_v61 = vadd.f32 %v3149_v52, %v4530_v43  ;;  %v1811_v42 = vpop.f32.mrb[1].mxu1 }
 0x300   : > { %v1997_v47 = vpack.c.bf16 %v1970_v50, %v1969_v62  ;;  %v1941_v12 = vadd.f32 %v4530_v43, %v1811_v42  ;;  %v3150_v44 = vpop.f32.mrb[2].mxu1 }
 0x301   : > { %v1944_v15 = vadd.f32 %v3150_v44, %v4530_v43  ;;  %v1814_v14 = vpop.f32.mrb[3].mxu1  ;;  %v1975_v59 = vmax.f32 %v1943_v61, 0.0 }
 0x302   : > { %v1942_v36 = vadd.f32 %v4530_v43, %v1814_v14  ;;  %3179 = vmatprep.mubr.msk.bf16.mxu0 %vm1127_vm4, %v1997_v47  ;;  %v1973_v19 = vmax.f32 %v1941_v12, 0.0 }
 0x303   : > { %v1976_v41 = vmax.f32 %v1944_v15, 0.0  ;;  %3180 = vmatmul.mubr.msk.bf16.gmra.mrb[52].mxu0 %vm1127_vm4, %v1998_v4 }
 0x304   : > { %v1974_v56 = vmax.f32 %v1942_v36, 0.0  ;;  %v4583_v36 = vld [vmem:[%s4714_s6] ss:$0 sm:$0xff] }
 0x305   : > { %v2000_v63 = vpack.c.bf16 %v1976_v41, %v1975_v59  ;;  %v3542_v59 = vld [vmem:[%s3729_s23 + $0x8] sm:$0xff]   ;;  %v3543_v41 = vld [vmem:[%s3729_s23] sm:$0xff]  }
 0x306   : > { %v1999_v0 = vpack.c.bf16 %v1974_v56, %v1973_v19  ;;  %v3153_v18 = vpop.f32.mrb[4].mxu1  ;;  %v2241_v19 = vunpack.c.l.bf16 %v3543_v41 }
 0x307   : > { %v1947_v55 = vadd.f32 %v3153_v18, %v4530_v43  ;;  %v1827_v10 = vpop.f32.mrb[5].mxu1  ;;  %v2244_v18 = vunpack.c.h.bf16 %v3542_v59 }
 0x308   : > { %v1945_v3 = vadd.f32 %v4530_v43, %v1827_v10  ;;  %v3154_v5 = vpop.f32.mrb[6].mxu1  ;;  %3183 = vmatprep.mubr.msk.bf16.mxu0 %vm1127_vm4, %v1999_v0 }
 0x309   : > { %v1948_v11 = vadd.f32 %v3154_v5, %v4530_v43  ;;  %v1830_v30 = vpop.f32.mrb[7].mxu1  ;;  %v1979_v40 = vmax.f32 %v1947_v55, 0.0  ;;  %v2242_v55 = vunpack.c.h.bf16 %v3543_v41 }
 0x30a   : > { %v1946_v37 = vadd.f32 %v4530_v43, %v1830_v30  ;;  %v1977_v23 = vmax.f32 %v1945_v3, 0.0 }
 0x30b   : > { %v1980_v46 = vmax.f32 %v1948_v11, 0.0  ;;  %3184 = vmatmul.mubr.msk.bf16.gmra.mrb[56].mxu0 %vm1127_vm4, %v2000_v63 }
 0x30c   : > { %v1978_v21 = vmax.f32 %v1946_v37, 0.0 }
 0x30d   : > { %v2002_v49 = vpack.c.bf16 %v1980_v46, %v1979_v40 }
 0x30e   : > { %v2001_v25 = vpack.c.bf16 %v1978_v21, %v1977_v23  ;;  %v3157_v22 = vpop.f32.mrb[8].mxu1 }
 0x30f   : > { %v1951_v6 = vadd.f32 %v3157_v22, %v4530_v43  ;;  %v1843_v54 = vpop.f32.mrb[9].mxu1 }
 0x310   : > { %v1949_v9 = vadd.f32 %v4530_v43, %v1843_v54  ;;  %v3158_v31 = vpop.f32.mrb[10].mxu1  ;;  %3187 = vmatprep.mubr.msk.bf16.mxu0 %vm1127_vm4, %v2001_v25  ;;  %v3544_v25 = vld [vmem:[%s3729_s23 + $0x18] sm:$0xff]  }
 0x311   : > { %v1952_v35 = vadd.f32 %v3158_v31, %v4530_v43  ;;  %v1846_v34 = vpop.f32.mrb[11].mxu1  ;;  %v1983_v45 = vmax.f32 %v1951_v6, 0.0  ;;  %v2247_v22 = vunpack.c.l.bf16 %v3544_v25  ;;  %v3545_v31 = vld [vmem:[%s3729_s23 + $0x10] sm:$0xff]  }
 0x312   : > { %v1950_v16 = vadd.f32 %v4530_v43, %v1846_v34  ;;  %v1981_v13 = vmax.f32 %v1949_v9, 0.0 }
 0x313   : > { %v1984_v48 = vmax.f32 %v1952_v35, 0.0  ;;  %3188 = vmatmul.mubr.msk.bf16.gmra.mrb[60].mxu0 %vm1127_vm4, %v2002_v49  ;;  %v2245_v35 = vunpack.c.l.bf16 %v3545_v31 }
 0x314   : > { %v1982_v27 = vmax.f32 %v1950_v16, 0.0 }
 0x315   : > { %v2004_v32 = vpack.c.bf16 %v1984_v48, %v1983_v45  ;;  %v2248_v48 = vunpack.c.h.bf16 %v3544_v25 }
 0x316   : > { %v2003_v2 = vpack.c.bf16 %v1982_v27, %v1981_v13  ;;  %v3161_v1 = vpop.f32.mrb[12].mxu1 }
 0x317   : > { %v1955_v7 = vadd.f32 %v3161_v1, %v4530_v43  ;;  %v1859_v38 = vpop.f32.mrb[13].mxu1 }
 0x318   : > { %v1953_v8 = vadd.f32 %v4530_v43, %v1859_v38  ;;  %v3162_v58 = vpop.f32.mrb[14].mxu1  ;;  %3191 = vmatprep.mubr.msk.bf16.mxu0 %vm1127_vm4, %v2003_v2  ;;  %v2246_v2 = vunpack.c.h.bf16 %v3545_v31 }
 0x319   : > { %v1956_v53 = vadd.f32 %v3162_v58, %v4530_v43  ;;  %v1862_v24 = vpop.f32.mrb[15].mxu1  ;;  %v1987_v57 = vmax.f32 %v1955_v7, 0.0 }
 0x31a   : > { %v1954_v60 = vadd.f32 %v4530_v43, %v1862_v24  ;;  %v1985_v29 = vmax.f32 %v1953_v8, 0.0 }
 0x31b   : > { %v1988_v17 = vmax.f32 %v1956_v53, 0.0  ;;  %3192 = vmatmul.mubr.msk.bf16.gmra.mrb[64].mxu0 %vm1127_vm4, %v2004_v32 }
 0x31c   : > { %v1986_v26 = vmax.f32 %v1954_v60, 0.0 }
 0x31d   : > { %v2006_v28 = vpack.c.bf16 %v1988_v17, %v1987_v57  ;;  %v3546_v17 = vld [vmem:[%s3729_s23 + $0x28] sm:$0xff]  }
 0x31e   : > { %v2005_v20 = vpack.c.bf16 %v1986_v26, %v1985_v29  ;;  %v3165_v51 = vpop.f32.mrb[16].mxu1  ;;  %v2251_v29 = vunpack.c.l.bf16 %v3546_v17 }
 0x31f   : > { %v1959_v39 = vadd.f32 %v3165_v51, %v4530_v43  ;;  %v1875_v33 = vpop.f32.mrb[17].mxu1  ;;  %v3547_v51 = vld [vmem:[%s3729_s23 + $0x20] sm:$0xff]  }
 0x320   : > { %v1957_v62 = vadd.f32 %v4530_v43, %v1875_v33  ;;  %v3166_v50 = vpop.f32.mrb[18].mxu1  ;;  %3195 = vmatprep.mubr.msk.bf16.mxu0 %vm1127_vm4, %v2005_v20 }
 0x321   : > { %v1960_v52 = vadd.f32 %v3166_v50, %v4530_v43  ;;  %v1878_v4 = vpop.f32.mrb[19].mxu1  ;;  %v1991_v42 = vmax.f32 %v1959_v39, 0.0  ;;  %v2249_v39 = vunpack.c.l.bf16 %v3547_v51 }
 0x322   : > { %v1958_v61 = vadd.f32 %v4530_v43, %v1878_v4  ;;  %v1989_v12 = vmax.f32 %v1957_v62, 0.0  ;;  %v2243_v43 = vunpack.c.l.bf16 %v3542_v59 }
 0x323   : > { %v1992_v47 = vmax.f32 %v1960_v52, 0.0  ;;  %3196 = vmatmul.mubr.msk.bf16.gmra.mrb[68].mxu0 %vm1127_vm4, %v2006_v28  ;;  %v2252_v52 = vunpack.c.h.bf16 %v3546_v17 }
 0x324   : > { %v1990_v44 = vmax.f32 %v1958_v61, 0.0 }
 0x325   : > { %v2008_v15 = vpack.c.bf16 %v1992_v47, %v1991_v42  ;;  %v2250_v47 = vunpack.c.h.bf16 %v3547_v51 }
 0x326   : > { %v2007_v14 = vpack.c.bf16 %v1990_v44, %v1989_v12 }
 0x328   : > { %3199 = vmatprep.mubr.msk.bf16.mxu0 %vm1127_vm4, %v2007_v14 }
 0x32b   : > { %3200 = vmatmul.mubr.msk.bf16.gmra.mrb[72].mxu0 %vm1127_vm4, %v2008_v15 }
 0x3c6   : > { %v3173_v56 = vpop.f32.mrb[44].mxu0 }
 0x3c7   : > { %v2123_v63 = vadd.f32 %v3173_v56, %v4583_v36  ;;  %v2114_v0 = vpop.f32.mrb[45].mxu0 }
 0x3c8   : > { %v2115_v10 = vadd.f32 %v4583_v36, %v2114_v0  ;;  %v3174_v3 = vpop.f32.mrb[46].mxu0 }
 0x3c9   : > { %v2275_v5 = vadd.f32 %v2243_v43, %v2123_v63  ;;  %v2126_v11 = vadd.f32 %v3174_v3, %v4583_v36  ;;  %v2117_v30 = vpop.f32.mrb[47].mxu0  ;;  %v3548_v63 = vld [vmem:[%s3729_s23 + $0x38] sm:$0xff]   ;;  %v3549_v3 = vld [vmem:[%s3729_s23 + $0x30] sm:$0xff]  }
 0x3ca   : > { %v2273_v37 = vadd.f32 %v2241_v19, %v2115_v10  ;;  %v2118_v40 = vadd.f32 %v4583_v36, %v2117_v30  ;;  %v2255_v0 = vunpack.c.l.bf16 %v3548_v63 }
 0x3cb   : > { %v2276_v46 = vadd.f32 %v2244_v18, %v2126_v11  ;;  %v2307_v21 = vmax.f32 %v2275_v5, 0.0  ;;  %v2253_v5 = vunpack.c.l.bf16 %v3549_v3 }
 0x3cc   : > { %v2274_v23 = vadd.f32 %v2242_v55, %v2118_v40  ;;  %v2305_v6 = vmax.f32 %v2273_v37, 0.0  ;;  %v2256_v40 = vunpack.c.h.bf16 %v3548_v63 }
 0x3cd   : > { %v2308_v49 = vmax.f32 %v2276_v46, 0.0 }
 0x3ce   : > { %v2306_v54 = vmax.f32 %v2274_v23, 0.0  ;;  %v3177_v9 = vpop.f32.mrb[48].mxu0 }
 0x3cf   : > { %v2792_v34 = vpack.c.bf16 %v2308_v49, %v2307_v21  ;;  %v2139_v16 = vadd.f32 %v3177_v9, %v4583_v36  ;;  %v2130_v45 = vpop.f32.mrb[49].mxu0  ;;  %v2254_v49 = vunpack.c.h.bf16 %v3549_v3 }
 0x3d0   : > { %v2787_v13 = vpack.c.bf16 %v2306_v54, %v2305_v6  ;;  %v2131_v27 = vadd.f32 %v4583_v36, %v2130_v45  ;;  %v3178_v32 = vpop.f32.mrb[50].mxu0  ;;  %v3550_v45 = vld [vmem:[%s3729_s23 + $0x48] sm:$0xff]  }
 0x3d1   : > { %2864 = vst [vmem:[%s4598_s20 + $0x8] sm:$0xff] %v2792_v34   ;;  %v2279_v1 = vadd.f32 %v2247_v22, %v2139_v16  ;;  %v2142_v7 = vadd.f32 %v3178_v32, %v4583_v36  ;;  %v2133_v38 = vpop.f32.mrb[51].mxu0 }
 0x3d2   : > { %2788 = vst [vmem:[%s4598_s20] sm:$0xff] %v2787_v13   ;;  %v2277_v8 = vadd.f32 %v2245_v35, %v2131_v27  ;;  %v2134_v58 = vadd.f32 %v4583_v36, %v2133_v38 }
 0x3d3   : > { %v2280_v53 = vadd.f32 %v2248_v48, %v2142_v7  ;;  %v2311_v60 = vmax.f32 %v2279_v1, 0.0  ;;  %v2259_v48 = vunpack.c.l.bf16 %v3550_v45 }
 0x3d4   : > { %v2278_v24 = vadd.f32 %v2246_v2, %v2134_v58  ;;  %v2309_v26 = vmax.f32 %v2277_v8, 0.0  ;;  %v3551_v2 = vld [vmem:[%s3729_s23 + $0x40] sm:$0xff]   ;;  %v2260_v58 = vunpack.c.h.bf16 %v3550_v45 }
 0x3d5   : > { %v2312_v57 = vmax.f32 %v2280_v53, 0.0  ;;  %v2257_v1 = vunpack.c.l.bf16 %v3551_v2 }
 0x3d6   : > { %v2310_v28 = vmax.f32 %v2278_v24, 0.0  ;;  %v3181_v20 = vpop.f32.mrb[52].mxu0 }
 0x3d7   : > { %v2802_v33 = vpack.c.bf16 %v2312_v57, %v2311_v60  ;;  %v2155_v62 = vadd.f32 %v3181_v20, %v4583_v36  ;;  %v2146_v50 = vpop.f32.mrb[53].mxu0  ;;  %v2258_v57 = vunpack.c.h.bf16 %v3551_v2 }
 0x3d8   : > { %v2797_v4 = vpack.c.bf16 %v2310_v28, %v2309_v26  ;;  %v2147_v61 = vadd.f32 %v4583_v36, %v2146_v50  ;;  %v3182_v42 = vpop.f32.mrb[54].mxu0  ;;  %v3552_v50 = vld [vmem:[%s3729_s23 + $0x58] sm:$0xff]  }
 0x3d9   : > { %2866 = vst [vmem:[%s4598_s20 + $0x18] sm:$0xff] %v2802_v33   ;;  %v2283_v12 = vadd.f32 %v2251_v29, %v2155_v62  ;;  %v2158_v44 = vadd.f32 %v3182_v42, %v4583_v36  ;;  %v2149_v15 = vpop.f32.mrb[55].mxu0 }
 0x3da   : > { %2865 = vst [vmem:[%s4598_s20 + $0x10] sm:$0xff] %v2797_v4   ;;  %v2281_v14 = vadd.f32 %v2249_v39, %v2147_v61  ;;  %v2150_v59 = vadd.f32 %v4583_v36, %v2149_v15 }
 0x3db   : > { %v2284_v43 = vadd.f32 %v2252_v52, %v2158_v44  ;;  %v2315_v19 = vmax.f32 %v2283_v12, 0.0  ;;  %v2263_v52 = vunpack.c.l.bf16 %v3552_v50 }
 0x3dc   : > { %v2282_v41 = vadd.f32 %v2250_v47, %v2150_v59  ;;  %v2313_v18 = vmax.f32 %v2281_v14, 0.0  ;;  %v3553_v47 = vld [vmem:[%s3729_s23 + $0x50] sm:$0xff]   ;;  %v2264_v59 = vunpack.c.h.bf16 %v3552_v50 }
 0x3dd   : > { %v2316_v56 = vmax.f32 %v2284_v43, 0.0  ;;  %v2261_v12 = vunpack.c.l.bf16 %v3553_v47 }
 0x3de   : > { %v2314_v55 = vmax.f32 %v2282_v41, 0.0  ;;  %v3185_v10 = vpop.f32.mrb[56].mxu0 }
 0x3df   : > { %v2812_v11 = vpack.c.bf16 %v2316_v56, %v2315_v19  ;;  %v2171_v30 = vadd.f32 %v3185_v10, %v4583_v36  ;;  %v2162_v37 = vpop.f32.mrb[57].mxu0  ;;  %v2262_v56 = vunpack.c.h.bf16 %v3553_v47 }
 0x3e0   : > { %v2807_v46 = vpack.c.bf16 %v2314_v55, %v2313_v18  ;;  %v2163_v23 = vadd.f32 %v4583_v36, %v2162_v37  ;;  %v3186_v21 = vpop.f32.mrb[58].mxu0  ;;  %v3554_v37 = vld [vmem:[%s3729_s23 + $0x68] sm:$0xff]  }
 0x3e1   : > { %2868 = vst [vmem:[%s4598_s20 + $0x28] sm:$0xff] %v2812_v11   ;;  %v2287_v25 = vadd.f32 %v2255_v0, %v2171_v30  ;;  %v2174_v22 = vadd.f32 %v3186_v21, %v4583_v36  ;;  %v2165_v6 = vpop.f32.mrb[59].mxu0 }
 0x3e2   : > { %2867 = vst [vmem:[%s4598_s20 + $0x20] sm:$0xff] %v2807_v46   ;;  %v2285_v54 = vadd.f32 %v2253_v5, %v2163_v23  ;;  %v2166_v9 = vadd.f32 %v4583_v36, %v2165_v6 }
 0x3e3   : > { %v2288_v31 = vadd.f32 %v2256_v40, %v2174_v22  ;;  %v2319_v34 = vmax.f32 %v2287_v25, 0.0  ;;  %v2267_v40 = vunpack.c.l.bf16 %v3554_v37 }
 0x3e4   : > { %v2286_v35 = vadd.f32 %v2254_v49, %v2166_v9  ;;  %v2317_v13 = vmax.f32 %v2285_v54, 0.0  ;;  %v3555_v49 = vld [vmem:[%s3729_s23 + $0x60] sm:$0xff]   ;;  %v2268_v9 = vunpack.c.h.bf16 %v3554_v37 }
 0x3e5   : > { %v2320_v16 = vmax.f32 %v2288_v31, 0.0  ;;  %v2265_v25 = vunpack.c.l.bf16 %v3555_v49 }
 0x3e6   : > { %v2318_v27 = vmax.f32 %v2286_v35, 0.0  ;;  %v3189_v32 = vpop.f32.mrb[60].mxu0 }
 0x3e7   : > { %v2822_v7 = vpack.c.bf16 %v2320_v16, %v2319_v34  ;;  %v2187_v38 = vadd.f32 %v3189_v32, %v4583_v36  ;;  %v2178_v8 = vpop.f32.mrb[61].mxu0  ;;  %v2266_v16 = vunpack.c.h.bf16 %v3555_v49 }
 0x3e8   : > { %v2817_v53 = vpack.c.bf16 %v2318_v27, %v2317_v13  ;;  %v2179_v24 = vadd.f32 %v4583_v36, %v2178_v8  ;;  %v3190_v60 = vpop.f32.mrb[62].mxu0  ;;  %v3556_v8 = vld [vmem:[%s3729_s23 + $0x78] sm:$0xff]  }
 0x3e9   : > { %2870 = vst [vmem:[%s4598_s20 + $0x38] sm:$0xff] %v2822_v7   ;;  %v2291_v17 = vadd.f32 %v2259_v48, %v2187_v38  ;;  %v2190_v29 = vadd.f32 %v3190_v60, %v4583_v36  ;;  %v2181_v26 = vpop.f32.mrb[63].mxu0 }
 0x3ea   : > { %2869 = vst [vmem:[%s4598_s20 + $0x30] sm:$0xff] %v2817_v53   ;;  %v2289_v28 = vadd.f32 %v2257_v1, %v2179_v24  ;;  %v2182_v20 = vadd.f32 %v4583_v36, %v2181_v26 }
 0x3eb   : > { %v2292_v51 = vadd.f32 %v2260_v58, %v2190_v29  ;;  %v2323_v33 = vmax.f32 %v2291_v17, 0.0  ;;  %v2271_v58 = vunpack.c.l.bf16 %v3556_v8 }
 0x3ec   : > { %v2290_v39 = vadd.f32 %v2258_v57, %v2182_v20  ;;  %v2321_v4 = vmax.f32 %v2289_v28, 0.0  ;;  %v3557_v57 = vld [vmem:[%s3729_s23 + $0x70] sm:$0xff]   ;;  %v2272_v20 = vunpack.c.h.bf16 %v3556_v8  ;;  %s2783_s23 = sshll.u32 %s3688_s28, 11  ;;  %s4665_s28 = scalar_lea.sflag [#allocation3], %s269_s18 }
 0x3ed   : > { %v2324_v62 = vmax.f32 %v2292_v51, 0.0  ;;  %v2269_v17 = vunpack.c.l.bf16 %v3557_v57  ;;  %s4657_s9 = scalar_lea.hbm %s4715_s7, %s2783_s23 }
 0x3ee   : > { %v2322_v61 = vmax.f32 %v2290_v39, 0.0  ;;  %v3193_v42 = vpop.f32.mrb[64].mxu0 }
 0x3ef   : > { %v2832_v44 = vpack.c.bf16 %v2324_v62, %v2323_v33  ;;  %v2203_v15 = vadd.f32 %v3193_v42, %v4583_v36  ;;  %v2194_v14 = vpop.f32.mrb[65].mxu0  ;;  %v2270_v62 = vunpack.c.h.bf16 %v3557_v57 }
 0x3f0   : > { %v2827_v43 = vpack.c.bf16 %v2322_v61, %v2321_v4  ;;  %v2195_v41 = vadd.f32 %v4583_v36, %v2194_v14  ;;  %v3194_v19 = vpop.f32.mrb[66].mxu0 }
 0x3f1   : > { %2872 = vst [vmem:[%s4598_s20 + $0x48] sm:$0xff] %v2832_v44   ;;  %v2295_v63 = vadd.f32 %v2263_v52, %v2203_v15  ;;  %v2206_v0 = vadd.f32 %v3194_v19, %v4583_v36  ;;  %v2197_v18 = vpop.f32.mrb[67].mxu0 }
 0x3f2   : > { %2871 = vst [vmem:[%s4598_s20 + $0x40] sm:$0xff] %v2827_v43   ;;  %v2293_v55 = vadd.f32 %v2261_v12, %v2195_v41  ;;  %v2198_v10 = vadd.f32 %v4583_v36, %v2197_v18 }
 0x3f3   : > { %v2296_v3 = vadd.f32 %v2264_v59, %v2206_v0  ;;  %v2327_v11 = vmax.f32 %v2295_v63, 0.0 }
 0x3f4   : > { %v2294_v5 = vadd.f32 %v2262_v56, %v2198_v10  ;;  %v2325_v46 = vmax.f32 %v2293_v55, 0.0 }
 0x3f5   : > { %v2328_v30 = vmax.f32 %v2296_v3, 0.0 }
 0x3f6   : > { %v2326_v23 = vmax.f32 %v2294_v5, 0.0  ;;  %v3197_v21 = vpop.f32.mrb[68].mxu0 }
 0x3f7   : > { %v2842_v22 = vpack.c.bf16 %v2328_v30, %v2327_v11  ;;  %v2219_v6 = vadd.f32 %v3197_v21, %v4583_v36  ;;  %v2210_v54 = vpop.f32.mrb[69].mxu0 }
 0x3f8   : > { %v2837_v31 = vpack.c.bf16 %v2326_v23, %v2325_v46  ;;  %v2211_v35 = vadd.f32 %v4583_v36, %v2210_v54  ;;  %v3198_v34 = vpop.f32.mrb[70].mxu0 }
 0x3f9   : > { %2874 = vst [vmem:[%s4598_s20 + $0x58] sm:$0xff] %v2842_v22   ;;  %v2299_v45 = vadd.f32 %v2267_v40, %v2219_v6  ;;  %v2222_v48 = vadd.f32 %v3198_v34, %v4583_v36  ;;  %v2213_v13 = vpop.f32.mrb[71].mxu0 }
 0x3fa   : > { %2873 = vst [vmem:[%s4598_s20 + $0x50] sm:$0xff] %v2837_v31   ;;  %v2297_v27 = vadd.f32 %v2265_v25, %v2211_v35  ;;  %v2214_v32 = vadd.f32 %v4583_v36, %v2213_v13 }
 0x3fb   : > { %v2300_v2 = vadd.f32 %v2268_v9, %v2222_v48  ;;  %v2331_v7 = vmax.f32 %v2299_v45, 0.0 }
 0x3fc   : > { %v2298_v1 = vadd.f32 %v2266_v16, %v2214_v32  ;;  %v2329_v53 = vmax.f32 %v2297_v27, 0.0 }
 0x3fd   : > { %v2332_v38 = vmax.f32 %v2300_v2, 0.0 }
 0x3fe   : > { %v2330_v24 = vmax.f32 %v2298_v1, 0.0  ;;  %v3201_v60 = vpop.f32.mrb[72].mxu0 }
 0x3ff   : > { %v2852_v29 = vpack.c.bf16 %v2332_v38, %v2331_v7  ;;  %v2235_v26 = vadd.f32 %v3201_v60, %v4583_v36  ;;  %v2226_v28 = vpop.f32.mrb[73].mxu0 }
 0x400   : > { %v2847_v51 = vpack.c.bf16 %v2330_v24, %v2329_v53  ;;  %v2227_v39 = vadd.f32 %v4583_v36, %v2226_v28  ;;  %v3202_v33 = vpop.f32.mrb[74].mxu0 }
 0x401   : > { %2876 = vst [vmem:[%s4598_s20 + $0x68] sm:$0xff] %v2852_v29   ;;  %v2303_v50 = vadd.f32 %v2271_v58, %v2235_v26  ;;  %v2238_v52 = vadd.f32 %v3202_v33, %v4583_v36  ;;  %v2229_v4 = vpop.f32.mrb[75].mxu0 }
 0x402   : > { %2875 = vst [vmem:[%s4598_s20 + $0x60] sm:$0xff] %v2847_v51   ;;  %v2301_v61 = vadd.f32 %v2269_v17, %v2227_v39  ;;  %v2230_v42 = vadd.f32 %v4583_v36, %v2229_v4 }
 0x403   : > { %v2304_v47 = vadd.f32 %v2272_v20, %v2238_v52  ;;  %v2335_v44 = vmax.f32 %v2303_v50, 0.0 }
 0x404   : > { %v2302_v12 = vadd.f32 %v2270_v62, %v2230_v42  ;;  %v2333_v14 = vmax.f32 %v2301_v61, 0.0 }
 0x405   : > { %v2336_v15 = vmax.f32 %v2304_v47, 0.0 }
 0x406   : > { %v2334_v59 = vmax.f32 %v2302_v12, 0.0 }
 0x407   : > { %v2862_v43 = vpack.c.bf16 %v2336_v15, %v2335_v44 }
 0x408   : > { %v2857_v41 = vpack.c.bf16 %v2334_v59, %v2333_v14 }
 0x409   : > { %2878 = vst [vmem:[%s4598_s20 + $0x78] sm:$0xff] %v2862_v43  }
 0x40a   : > { %2877 = vst [vmem:[%s4598_s20 + $0x70] sm:$0xff] %v2857_v41  }
 0x40b   : > { %3571 = shalt.err (!%p3568_p3)
}
 0x40c   : > { %s3572_s17 = scalar_lea.hbm %s4657_s9, 2048  ;;  %s3576_s20 = scalar_lea.hbm %s4715_s7, 4096 }
 0x40d   : > { %p3573_p4 = scmp.ne.s32.totalorder %s4657_s9, %s3572_s17  ;;  %p3577_p9 = scmp.lt.u32.totalorder %s4657_s9, %s4715_s7 }
 0x40e   : > { %p3578_p10 = scmp.lt.u32.totalorder %s3576_s20, %s3572_s17  ;;  %p3580_p12 = scmp.lt.u32.totalorder %s3572_s17, %s4657_s9 }
 0x40f   : > { %p3574_p7 = pnand %p3573_p4, %p3705_p5 }
 0x410   : > { %p3579_p11 = por %p3578_p10, %p3577_p9 }
 0x411   : > { %p3575_p8 = pneg %p3574_p7 }
 0x412   : > { %p3581_p13 = por %p3580_p12, %p3579_p11 }
 0x414   : > { %p3582_p0 = pnand %p3581_p13, %p3575_p8 }
 0x416   : > { %3585 = shalt.err (!%p3582_p0)
}
 0x417   : > { %s3626_s29 = smov 4  }
 0x418   : > { %3279 = dma.vmem_to_hbm [thread:$0]  (%p3705_p5), %s4659_s21, 2048, %s4657_s9, %s4665_s28, %s3623_s8, %s3623_s8, %s3626_s29  }
 0x419 PF: > { %p3285_p1 = scmp.ge.s32.totalorder %s3620_s27, 2  ;;  %s2526_s13 = sand.u32 1, %s3608_s24  }
 0x41a   : > { %s2527_s14 = scalar_lea.sflag [#allocation3], %s2526_s13 }
 0x41b   : > { %p3282_p2 = pnand %p3285_p1, %p3709_p6 }
 0x41d   : > { %3603 = dma.done.wait (!%p3282_p2), %s2527_s14, 2048  }
 0x41e   : > { %3605 = vsyncadd (!%p3282_p2), %s2527_s14, 4294965248  ;;  %p17_p3 = scmp.ge.s32.totalorder %s3692_s30, 4   ;;  %s4760_s24 = smov %s3612_s25 }
 0x41f   : > { %s4761_s25 = smov %s3616_s26  ;;  %s4762_s26 = smov %s3703_s10 }
 0x420   : > { %s4763_s27 = smov %s3692_s30  ;;  %19 = sbr.rel (!%p17_p3) target bundleno = 3 (0x3), region = 85 }
 0x427   :  { %2532 = vsyncpa [#allocation3], 1 }
 0x428   :  { %2534 = vsyncpa [#allocation3 + $0x1], 1 }

</bundles_post_ra>
